<compile_context>
chip_gen: v6e
topology: v6e:2x2x1
jax: 0.10.0
libtpu: 0.0.40
codegen_flags: <defaults>
</compile_context>

<pallas_src>
import functools
import math

import jax
import jax.numpy as jnp
from jax.experimental import pallas as pl
from jax.experimental.pallas import tpu as pltpu


def _attention_kernel(x_ref, wq_ref, wk_ref, wv_ref, wproj_ref, bproj_ref,
                      out_ref, attn_ref, *, num_heads, scale, compute_dtype):
    Bblk, N, C = x_ref.shape
    H = num_heads
    hd = C // H

    # ---- QKV projections: (Bblk*N, C) x (C, C), MXU-friendly row count -----
    x2 = x_ref[...].reshape(Bblk * N, C).astype(compute_dtype)
    q = jnp.dot(x2, wq_ref[...], preferred_element_type=jnp.float32)
    k = jnp.dot(x2, wk_ref[...], preferred_element_type=jnp.float32)
    v = jnp.dot(x2, wv_ref[...], preferred_element_type=jnp.float32)

    def split_heads(t):
        # (Bblk*N, C) -> (Bblk*H, N, hd); head extraction via lane slices,
        # packed once into a leading batch*head axis for batched matmuls.
        t = t.reshape(Bblk, N, C)
        parts = [t[:, :, h * hd:(h + 1) * hd].reshape(Bblk, 1, N, hd)
                 for h in range(H)]
        return jnp.concatenate(parts, axis=1).reshape(Bblk * H, N, hd)

    qh = split_heads(q).astype(compute_dtype)
    kh = split_heads(k).astype(compute_dtype)
    vh = split_heads(v).astype(compute_dtype)

    # ---- batched scaled dot-product attention -------------------------------
    s = jnp.einsum('bqd,bkd->bqk', qh, kh,
                   preferred_element_type=jnp.float32) * scale   # (Bblk*H, N, N)

    # numerically stable softmax, kept in f32
    s = s - jnp.max(s, axis=-1, keepdims=True)
    e = jnp.exp(s)
    a = e / jnp.sum(e, axis=-1, keepdims=True)                   # (Bblk*H, N, N)

    # single store of the whole attention block for this grid step
    attn_ref[...] = a.reshape(Bblk, H, N, N).astype(attn_ref.dtype)

    ctx = jnp.einsum('bqk,bkd->bqd', a.astype(compute_dtype), vh,
                     preferred_element_type=jnp.float32)         # (Bblk*H, N, hd)

    # merge heads back to (Bblk*N, C)
    ctx4 = ctx.reshape(Bblk, H, N, hd)
    o = jnp.concatenate([ctx4[:, h] for h in range(H)], axis=-1)  # (Bblk, N, C)
    o = o.reshape(Bblk * N, C).astype(compute_dtype)

    # ---- output projection (with bias) --------------------------------------
    y = jnp.dot(o, wproj_ref[...], preferred_element_type=jnp.float32)
    y = y + bproj_ref[...].astype(jnp.float32)
    out_ref[...] = y.reshape(Bblk, N, C).astype(out_ref.dtype)


def _pick_block_batch(B, N):
    """Batch elements per grid step so Bblk*N ~ MXU height (<=256 rows)."""
    target_rows = 256
    bblk = max(1, min(B, target_rows // max(N, 1)))
    while B % bblk:
        bblk -= 1
    return max(1, bblk)


def attention_forward(x, w_qkv, w_proj, b_proj, num_heads,
                      compute_dtype=jnp.float32):
    B, N, C = x.shape
    assert C % num_heads == 0
    hd = C // num_heads
    scale = hd ** (-0.5)

    # Pre-split the fused QKV weight at trace time (free) so the kernel never
    # lane-slices a fused (N, 3C) activation.  Cast weights once to the
    # compute dtype (halves weight DMA bytes in bf16 mode).
    w_q = w_qkv[:, 0 * C:1 * C].astype(compute_dtype)
    w_k = w_qkv[:, 1 * C:2 * C].astype(compute_dtype)
    w_v = w_qkv[:, 2 * C:3 * C].astype(compute_dtype)
    w_p = w_proj.astype(compute_dtype)
    b_p = b_proj.reshape(1, C).astype(jnp.float32)

    bblk = _pick_block_batch(B, N)
    grid = (B // bblk,)

    kernel = functools.partial(_attention_kernel, num_heads=num_heads,
                               scale=scale, compute_dtype=compute_dtype)

    # Explicit scoped-VMEM budget: double-buffered x/out/attn blocks plus the
    # (grid-invariant) weights, with headroom; clamped to [32 MiB, 64 MiB] so
    # it is valid on v5e/v6e (128 MiB physical) and v7x (64 MiB physical).
    cd = jnp.dtype(compute_dtype).itemsize
    xd = jnp.dtype(x.dtype).itemsize
    est = 2 * (2 * bblk * N * C * xd                # x in + out blocks
               + bblk * num_heads * N * N * 4       # attn output block (f32)
               + 4 * C * C * cd + C * 4)            # weights + bias
    vmem_limit = int(min(64 << 20, max(32 << 20, 4 * est)))

    out, attn = pl.pallas_call(
        kernel,
        out_shape=(
            jax.ShapeDtypeStruct((B, N, C), x.dtype),
            jax.ShapeDtypeStruct((B, num_heads, N, N), jnp.float32),
        ),
        grid_spec=pltpu.PrefetchScalarGridSpec(
            num_scalar_prefetch=0,
            grid=grid,
            in_specs=[
                pl.BlockSpec((bblk, N, C), lambda b: (b, 0, 0)),        # x
                pl.BlockSpec((C, C), lambda b: (0, 0)),                 # W_q
                pl.BlockSpec((C, C), lambda b: (0, 0)),                 # W_k
                pl.BlockSpec((C, C), lambda b: (0, 0)),                 # W_v
                pl.BlockSpec((C, C), lambda b: (0, 0)),                 # W_proj
                pl.BlockSpec((1, C), lambda b: (0, 0)),                 # b_proj
            ],
            out_specs=(
                pl.BlockSpec((bblk, N, C), lambda b: (b, 0, 0)),
                pl.BlockSpec((bblk, num_heads, N, N), lambda b: (b, 0, 0, 0)),
            ),
        ),
        compiler_params=pltpu.CompilerParams(
            dimension_semantics=("parallel",),
            vmem_limit_bytes=vmem_limit,
        ),
    )(x, w_q, w_k, w_v, w_p, b_p)
    return out, attn


def attention_reference(x, w_qkv, w_proj, b_proj, num_heads):
    """Plain-JAX reference mirroring the PyTorch forward."""
    B, N, C = x.shape
    hd = C // num_heads
    scale = hd ** (-0.5)
    qkv = x @ w_qkv                                          # (B, N, 3C)
    qkv = qkv.reshape(B, N, 3, num_heads, hd).transpose(2, 0, 3, 1, 4)
    q, k, v = qkv[0], qkv[1], qkv[2]                         # (B, H, N, hd)
    attn = jnp.einsum('bhnd,bhmd->bhnm', q, k) * scale
    attn = jax.nn.softmax(attn, axis=-1)
    o = jnp.einsum('bhnm,bhmd->bhnd', attn, v)
    o = o.transpose(0, 2, 1, 3).reshape(B, N, C)
    return o @ w_proj + b_proj, attn


if __name__ == "__main__":
    # Small shapes consistent with the module: dim=32, num_heads=8 (head_dim=4).
    B, N, C, H = 2, 8, 32, 8

    key = jax.random.PRNGKey(0)
    kx, kqkv, kproj, kb = jax.random.split(key, 4)

    x = jax.random.normal(kx, (B, N, C), dtype=jnp.float32)
    w_qkv = jax.random.normal(kqkv, (C, 3 * C), dtype=jnp.float32) / math.sqrt(C)
    w_proj = jax.random.normal(kproj, (C, C), dtype=jnp.float32) / math.sqrt(C)
    b_proj = jax.random.normal(kb, (C,), dtype=jnp.float32) * 0.02

    out_ref, attn_ref_ = attention_reference(x, w_qkv, w_proj, b_proj, H)

    # --- f32 compute path (tight tolerances, matches module numerics) -------
    out, attn = attention_forward(x, w_qkv, w_proj, b_proj, H)
    out = jax.block_until_ready(out)
    attn = jax.block_until_ready(attn)
    assert out.shape == (B, N, C) and attn.shape == (B, H, N, N)
    assert jnp.allclose(out, out_ref, atol=1e-4, rtol=1e-4)
    assert jnp.allclose(attn, attn_ref_, atol=1e-5, rtol=1e-5)

    # --- bf16 matmul-operand path (v6e/v7x MXU throughput), f32 softmax -----
    out_bf, attn_bf = attention_forward(x, w_qkv, w_proj, b_proj, H,
                                        compute_dtype=jnp.bfloat16)
    out_bf = jax.block_until_ready(out_bf)
    attn_bf = jax.block_until_ready(attn_bf)
    assert jnp.allclose(out_bf, out_ref, atol=1e-1, rtol=1e-1)
    assert jnp.allclose(attn_bf, attn_ref_, atol=5e-2, rtol=5e-2)

    print("KERNEL_OK")
</pallas_src>

<mosaic_0001>
module attributes {stable_mosaic.version = 11 : i64} {
  func.func @_attention_kernel(%arg0: i32, %arg1: memref<2x8x32xf32, #tpu.memory_space<vmem>>, %arg2: memref<32x32xf32, #tpu.memory_space<vmem>>, %arg3: memref<32x32xf32, #tpu.memory_space<vmem>>, %arg4: memref<32x32xf32, #tpu.memory_space<vmem>>, %arg5: memref<32x32xf32, #tpu.memory_space<vmem>>, %arg6: memref<1x32xf32, #tpu.memory_space<vmem>>, %arg7: memref<2x8x32xf32, #tpu.memory_space<vmem>>, %arg8: memref<2x8x8x8xf32, #tpu.memory_space<vmem>>) attributes {dimension_semantics = [#tpu.dimension_semantics<parallel>], iteration_bounds = array<i64: 1>, scalar_prefetch = 0 : i64, scratch_operands = 0 : i64, tpu.core_type = #tpu.core_type<tc>, window_params = [{transform_indices = @transform_0, window_bounds = array<i64: 2, 8, 32>}, {pipeline_mode = #tpu.pipeline_mode<synchronous>, transform_indices = @transform_1, window_bounds = array<i64: 32, 32>}, {pipeline_mode = #tpu.pipeline_mode<synchronous>, transform_indices = @transform_2, window_bounds = array<i64: 32, 32>}, {pipeline_mode = #tpu.pipeline_mode<synchronous>, transform_indices = @transform_3, window_bounds = array<i64: 32, 32>}, {pipeline_mode = #tpu.pipeline_mode<synchronous>, transform_indices = @transform_4, window_bounds = array<i64: 32, 32>}, {pipeline_mode = #tpu.pipeline_mode<synchronous>, transform_indices = @transform_5, window_bounds = array<i64: 1, 32>}, {transform_indices = @transform_6, window_bounds = array<i64: 2, 8, 32>}, {transform_indices = @transform_7, window_bounds = array<i64: 2, 8, 8, 8>}]} {
    %c0 = arith.constant 0 : index
    %c0_0 = arith.constant 0 : index
    %c0_1 = arith.constant 0 : index
    %0 = vector.load %arg1[%c0, %c0_0, %c0_1] : memref<2x8x32xf32, #tpu.memory_space<vmem>>, vector<2x8x32xf32>
    %1 = vector.shape_cast %0 : vector<2x8x32xf32> to vector<16x32xf32>
    %c0_2 = arith.constant 0 : index
    %c0_3 = arith.constant 0 : index
    %2 = vector.load %arg2[%c0_2, %c0_3] : memref<32x32xf32, #tpu.memory_space<vmem>>, vector<32x32xf32>
    %cst = arith.constant dense<0.000000e+00> : vector<16x32xf32>
    %3 = tpu.matmul %1, %2, %cst {dimension_numbers = #tpu.dot_dimension_numbers<[1], [0], [0], [1], [0, 0, 1, 1], [], []>} : vector<16x32xf32>, vector<32x32xf32>, vector<16x32xf32> -> vector<16x32xf32>
    %c0_4 = arith.constant 0 : index
    %c0_5 = arith.constant 0 : index
    %4 = vector.load %arg3[%c0_4, %c0_5] : memref<32x32xf32, #tpu.memory_space<vmem>>, vector<32x32xf32>
    %cst_6 = arith.constant dense<0.000000e+00> : vector<16x32xf32>
    %5 = tpu.matmul %1, %4, %cst_6 {dimension_numbers = #tpu.dot_dimension_numbers<[1], [0], [0], [1], [0, 0, 1, 1], [], []>} : vector<16x32xf32>, vector<32x32xf32>, vector<16x32xf32> -> vector<16x32xf32>
    %c0_7 = arith.constant 0 : index
    %c0_8 = arith.constant 0 : index
    %6 = vector.load %arg4[%c0_7, %c0_8] : memref<32x32xf32, #tpu.memory_space<vmem>>, vector<32x32xf32>
    %cst_9 = arith.constant dense<0.000000e+00> : vector<16x32xf32>
    %7 = tpu.matmul %1, %6, %cst_9 {dimension_numbers = #tpu.dot_dimension_numbers<[1], [0], [0], [1], [0, 0, 1, 1], [], []>} : vector<16x32xf32>, vector<32x32xf32>, vector<16x32xf32> -> vector<16x32xf32>
    %8 = vector.shape_cast %3 : vector<16x32xf32> to vector<2x8x32xf32>
    %9 = vector.extract_strided_slice %8 {offsets = [0, 0, 0], sizes = [2, 8, 4], strides = [1, 1, 1]} : vector<2x8x32xf32> to vector<2x8x4xf32>
    %10 = vector.shape_cast %9 : vector<2x8x4xf32> to vector<2x1x8x4xf32>
    %11 = vector.extract_strided_slice %8 {offsets = [0, 0, 4], sizes = [2, 8, 4], strides = [1, 1, 1]} : vector<2x8x32xf32> to vector<2x8x4xf32>
    %12 = vector.shape_cast %11 : vector<2x8x4xf32> to vector<2x1x8x4xf32>
    %13 = vector.extract_strided_slice %8 {offsets = [0, 0, 8], sizes = [2, 8, 4], strides = [1, 1, 1]} : vector<2x8x32xf32> to vector<2x8x4xf32>
    %14 = vector.shape_cast %13 : vector<2x8x4xf32> to vector<2x1x8x4xf32>
    %15 = vector.extract_strided_slice %8 {offsets = [0, 0, 12], sizes = [2, 8, 4], strides = [1, 1, 1]} : vector<2x8x32xf32> to vector<2x8x4xf32>
    %16 = vector.shape_cast %15 : vector<2x8x4xf32> to vector<2x1x8x4xf32>
    %17 = vector.extract_strided_slice %8 {offsets = [0, 0, 16], sizes = [2, 8, 4], strides = [1, 1, 1]} : vector<2x8x32xf32> to vector<2x8x4xf32>
    %18 = vector.shape_cast %17 : vector<2x8x4xf32> to vector<2x1x8x4xf32>
    %19 = vector.extract_strided_slice %8 {offsets = [0, 0, 20], sizes = [2, 8, 4], strides = [1, 1, 1]} : vector<2x8x32xf32> to vector<2x8x4xf32>
    %20 = vector.shape_cast %19 : vector<2x8x4xf32> to vector<2x1x8x4xf32>
    %21 = vector.extract_strided_slice %8 {offsets = [0, 0, 24], sizes = [2, 8, 4], strides = [1, 1, 1]} : vector<2x8x32xf32> to vector<2x8x4xf32>
    %22 = vector.shape_cast %21 : vector<2x8x4xf32> to vector<2x1x8x4xf32>
    %23 = vector.extract_strided_slice %8 {offsets = [0, 0, 28], sizes = [2, 8, 4], strides = [1, 1, 1]} : vector<2x8x32xf32> to vector<2x8x4xf32>
    %24 = vector.shape_cast %23 : vector<2x8x4xf32> to vector<2x1x8x4xf32>
    %25 = tpu.concatenate %10, %12, %14, %16, %18, %20, %22, %24 in 1 : vector<2x1x8x4xf32>, vector<2x1x8x4xf32>, vector<2x1x8x4xf32>, vector<2x1x8x4xf32>, vector<2x1x8x4xf32>, vector<2x1x8x4xf32>, vector<2x1x8x4xf32>, vector<2x1x8x4xf32> -> vector<2x8x8x4xf32>
    %26 = vector.shape_cast %25 : vector<2x8x8x4xf32> to vector<16x8x4xf32>
    %27 = vector.shape_cast %5 : vector<16x32xf32> to vector<2x8x32xf32>
    %28 = vector.extract_strided_slice %27 {offsets = [0, 0, 0], sizes = [2, 8, 4], strides = [1, 1, 1]} : vector<2x8x32xf32> to vector<2x8x4xf32>
    %29 = vector.shape_cast %28 : vector<2x8x4xf32> to vector<2x1x8x4xf32>
    %30 = vector.extract_strided_slice %27 {offsets = [0, 0, 4], sizes = [2, 8, 4], strides = [1, 1, 1]} : vector<2x8x32xf32> to vector<2x8x4xf32>
    %31 = vector.shape_cast %30 : vector<2x8x4xf32> to vector<2x1x8x4xf32>
    %32 = vector.extract_strided_slice %27 {offsets = [0, 0, 8], sizes = [2, 8, 4], strides = [1, 1, 1]} : vector<2x8x32xf32> to vector<2x8x4xf32>
    %33 = vector.shape_cast %32 : vector<2x8x4xf32> to vector<2x1x8x4xf32>
    %34 = vector.extract_strided_slice %27 {offsets = [0, 0, 12], sizes = [2, 8, 4], strides = [1, 1, 1]} : vector<2x8x32xf32> to vector<2x8x4xf32>
    %35 = vector.shape_cast %34 : vector<2x8x4xf32> to vector<2x1x8x4xf32>
    %36 = vector.extract_strided_slice %27 {offsets = [0, 0, 16], sizes = [2, 8, 4], strides = [1, 1, 1]} : vector<2x8x32xf32> to vector<2x8x4xf32>
    %37 = vector.shape_cast %36 : vector<2x8x4xf32> to vector<2x1x8x4xf32>
    %38 = vector.extract_strided_slice %27 {offsets = [0, 0, 20], sizes = [2, 8, 4], strides = [1, 1, 1]} : vector<2x8x32xf32> to vector<2x8x4xf32>
    %39 = vector.shape_cast %38 : vector<2x8x4xf32> to vector<2x1x8x4xf32>
    %40 = vector.extract_strided_slice %27 {offsets = [0, 0, 24], sizes = [2, 8, 4], strides = [1, 1, 1]} : vector<2x8x32xf32> to vector<2x8x4xf32>
    %41 = vector.shape_cast %40 : vector<2x8x4xf32> to vector<2x1x8x4xf32>
    %42 = vector.extract_strided_slice %27 {offsets = [0, 0, 28], sizes = [2, 8, 4], strides = [1, 1, 1]} : vector<2x8x32xf32> to vector<2x8x4xf32>
    %43 = vector.shape_cast %42 : vector<2x8x4xf32> to vector<2x1x8x4xf32>
    %44 = tpu.concatenate %29, %31, %33, %35, %37, %39, %41, %43 in 1 : vector<2x1x8x4xf32>, vector<2x1x8x4xf32>, vector<2x1x8x4xf32>, vector<2x1x8x4xf32>, vector<2x1x8x4xf32>, vector<2x1x8x4xf32>, vector<2x1x8x4xf32>, vector<2x1x8x4xf32> -> vector<2x8x8x4xf32>
    %45 = vector.shape_cast %44 : vector<2x8x8x4xf32> to vector<16x8x4xf32>
    %46 = vector.shape_cast %7 : vector<16x32xf32> to vector<2x8x32xf32>
    %47 = vector.extract_strided_slice %46 {offsets = [0, 0, 0], sizes = [2, 8, 4], strides = [1, 1, 1]} : vector<2x8x32xf32> to vector<2x8x4xf32>
    %48 = vector.shape_cast %47 : vector<2x8x4xf32> to vector<2x1x8x4xf32>
    %49 = vector.extract_strided_slice %46 {offsets = [0, 0, 4], sizes = [2, 8, 4], strides = [1, 1, 1]} : vector<2x8x32xf32> to vector<2x8x4xf32>
    %50 = vector.shape_cast %49 : vector<2x8x4xf32> to vector<2x1x8x4xf32>
    %51 = vector.extract_strided_slice %46 {offsets = [0, 0, 8], sizes = [2, 8, 4], strides = [1, 1, 1]} : vector<2x8x32xf32> to vector<2x8x4xf32>
    %52 = vector.shape_cast %51 : vector<2x8x4xf32> to vector<2x1x8x4xf32>
    %53 = vector.extract_strided_slice %46 {offsets = [0, 0, 12], sizes = [2, 8, 4], strides = [1, 1, 1]} : vector<2x8x32xf32> to vector<2x8x4xf32>
    %54 = vector.shape_cast %53 : vector<2x8x4xf32> to vector<2x1x8x4xf32>
    %55 = vector.extract_strided_slice %46 {offsets = [0, 0, 16], sizes = [2, 8, 4], strides = [1, 1, 1]} : vector<2x8x32xf32> to vector<2x8x4xf32>
    %56 = vector.shape_cast %55 : vector<2x8x4xf32> to vector<2x1x8x4xf32>
    %57 = vector.extract_strided_slice %46 {offsets = [0, 0, 20], sizes = [2, 8, 4], strides = [1, 1, 1]} : vector<2x8x32xf32> to vector<2x8x4xf32>
    %58 = vector.shape_cast %57 : vector<2x8x4xf32> to vector<2x1x8x4xf32>
    %59 = vector.extract_strided_slice %46 {offsets = [0, 0, 24], sizes = [2, 8, 4], strides = [1, 1, 1]} : vector<2x8x32xf32> to vector<2x8x4xf32>
    %60 = vector.shape_cast %59 : vector<2x8x4xf32> to vector<2x1x8x4xf32>
    %61 = vector.extract_strided_slice %46 {offsets = [0, 0, 28], sizes = [2, 8, 4], strides = [1, 1, 1]} : vector<2x8x32xf32> to vector<2x8x4xf32>
    %62 = vector.shape_cast %61 : vector<2x8x4xf32> to vector<2x1x8x4xf32>
    %63 = tpu.concatenate %48, %50, %52, %54, %56, %58, %60, %62 in 1 : vector<2x1x8x4xf32>, vector<2x1x8x4xf32>, vector<2x1x8x4xf32>, vector<2x1x8x4xf32>, vector<2x1x8x4xf32>, vector<2x1x8x4xf32>, vector<2x1x8x4xf32>, vector<2x1x8x4xf32> -> vector<2x8x8x4xf32>
    %64 = vector.shape_cast %63 : vector<2x8x8x4xf32> to vector<16x8x4xf32>
    "tpu.trace_start"() <{level = 10 : i32, message = "bqd,bkd->bqk"}> : () -> ()
    %cst_10 = arith.constant dense<0.000000e+00> : vector<16x8x8xf32>
    %65 = tpu.matmul %26, %45, %cst_10 {dimension_numbers = #tpu.dot_dimension_numbers<[2], [2], [1], [1], [0, 0, 0, 1, 1, 1], [0], [0]>} : vector<16x8x4xf32>, vector<16x8x4xf32>, vector<16x8x8xf32> -> vector<16x8x8xf32>
    "tpu.trace_stop"() : () -> ()
    %cst_11 = arith.constant 5.000000e-01 : f32
    %66 = vector.broadcast %cst_11 : f32 to vector<16x8x8xf32>
    %67 = arith.mulf %65, %66 : vector<16x8x8xf32>
    %cst_12 = arith.constant dense<0xFF800000> : vector<16x8xf32>
    %68 = vector.multi_reduction <maximumf>, %67, %cst_12 [2] : vector<16x8x8xf32> to vector<16x8xf32>
    %69 = vector.shape_cast %68 : vector<16x8xf32> to vector<16x8x1xf32>
    %70 = vector.broadcast %69 : vector<16x8x1xf32> to vector<16x8x8xf32>
    %71 = arith.subf %67, %70 : vector<16x8x8xf32>
    %72 = math.exp %71 : vector<16x8x8xf32>
    %cst_13 = arith.constant dense<0.000000e+00> : vector<16x8xf32>
    %73 = vector.multi_reduction <add>, %72, %cst_13 [2] : vector<16x8x8xf32> to vector<16x8xf32>
    %74 = vector.shape_cast %73 : vector<16x8xf32> to vector<16x8x1xf32>
    %75 = vector.broadcast %74 : vector<16x8x1xf32> to vector<16x8x8xf32>
    %76 = arith.divf %72, %75 : vector<16x8x8xf32>
    %77 = vector.shape_cast %76 : vector<16x8x8xf32> to vector<2x8x8x8xf32>
    %c0_14 = arith.constant 0 : index
    %c0_15 = arith.constant 0 : index
    %c0_16 = arith.constant 0 : index
    %c0_17 = arith.constant 0 : index
    %78 = vector.load %arg8[%c0_14, %c0_15, %c0_16, %c0_17] : memref<2x8x8x8xf32, #tpu.memory_space<vmem>>, vector<2x8x8x8xf32>
    tpu.vector_store %arg8[%c0_14, %c0_15, %c0_16, %c0_17], %77 {strides = array<i32>} : memref<2x8x8x8xf32, #tpu.memory_space<vmem>>, vector<2x8x8x8xf32>,
    "tpu.trace_start"() <{level = 10 : i32, message = "bqk,bkd->bqd"}> : () -> ()
    %cst_18 = arith.constant dense<0.000000e+00> : vector<16x8x4xf32>
    %79 = tpu.matmul %76, %64, %cst_18 {dimension_numbers = #tpu.dot_dimension_numbers<[2], [1], [1], [2], [0, 0, 0, 1, 1, 2], [0], [0]>} : vector<16x8x8xf32>, vector<16x8x4xf32>, vector<16x8x4xf32> -> vector<16x8x4xf32>
    "tpu.trace_stop"() : () -> ()
    %80 = vector.shape_cast %79 : vector<16x8x4xf32> to vector<2x8x8x4xf32>
    %81 = vector.extract_strided_slice %80 {offsets = [0, 0, 0, 0], sizes = [2, 1, 8, 4], strides = [1, 1, 1, 1]} : vector<2x8x8x4xf32> to vector<2x1x8x4xf32>
    %82 = vector.shape_cast %81 : vector<2x1x8x4xf32> to vector<2x8x4xf32>
    %83 = vector.extract_strided_slice %80 {offsets = [0, 1, 0, 0], sizes = [2, 1, 8, 4], strides = [1, 1, 1, 1]} : vector<2x8x8x4xf32> to vector<2x1x8x4xf32>
    %84 = vector.shape_cast %83 : vector<2x1x8x4xf32> to vector<2x8x4xf32>
    %85 = vector.extract_strided_slice %80 {offsets = [0, 2, 0, 0], sizes = [2, 1, 8, 4], strides = [1, 1, 1, 1]} : vector<2x8x8x4xf32> to vector<2x1x8x4xf32>
    %86 = vector.shape_cast %85 : vector<2x1x8x4xf32> to vector<2x8x4xf32>
    %87 = vector.extract_strided_slice %80 {offsets = [0, 3, 0, 0], sizes = [2, 1, 8, 4], strides = [1, 1, 1, 1]} : vector<2x8x8x4xf32> to vector<2x1x8x4xf32>
    %88 = vector.shape_cast %87 : vector<2x1x8x4xf32> to vector<2x8x4xf32>
    %89 = vector.extract_strided_slice %80 {offsets = [0, 4, 0, 0], sizes = [2, 1, 8, 4], strides = [1, 1, 1, 1]} : vector<2x8x8x4xf32> to vector<2x1x8x4xf32>
    %90 = vector.shape_cast %89 : vector<2x1x8x4xf32> to vector<2x8x4xf32>
    %91 = vector.extract_strided_slice %80 {offsets = [0, 5, 0, 0], sizes = [2, 1, 8, 4], strides = [1, 1, 1, 1]} : vector<2x8x8x4xf32> to vector<2x1x8x4xf32>
    %92 = vector.shape_cast %91 : vector<2x1x8x4xf32> to vector<2x8x4xf32>
    %93 = vector.extract_strided_slice %80 {offsets = [0, 6, 0, 0], sizes = [2, 1, 8, 4], strides = [1, 1, 1, 1]} : vector<2x8x8x4xf32> to vector<2x1x8x4xf32>
    %94 = vector.shape_cast %93 : vector<2x1x8x4xf32> to vector<2x8x4xf32>
    %95 = vector.extract_strided_slice %80 {offsets = [0, 7, 0, 0], sizes = [2, 1, 8, 4], strides = [1, 1, 1, 1]} : vector<2x8x8x4xf32> to vector<2x1x8x4xf32>
    %96 = vector.shape_cast %95 : vector<2x1x8x4xf32> to vector<2x8x4xf32>
    %97 = tpu.concatenate %82, %84, %86, %88, %90, %92, %94, %96 in 2 : vector<2x8x4xf32>, vector<2x8x4xf32>, vector<2x8x4xf32>, vector<2x8x4xf32>, vector<2x8x4xf32>, vector<2x8x4xf32>, vector<2x8x4xf32>, vector<2x8x4xf32> -> vector<2x8x32xf32>
    %98 = vector.shape_cast %97 : vector<2x8x32xf32> to vector<16x32xf32>
    %c0_19 = arith.constant 0 : index
    %c0_20 = arith.constant 0 : index
    %99 = vector.load %arg5[%c0_19, %c0_20] : memref<32x32xf32, #tpu.memory_space<vmem>>, vector<32x32xf32>
    %cst_21 = arith.constant dense<0.000000e+00> : vector<16x32xf32>
    %100 = tpu.matmul %98, %99, %cst_21 {dimension_numbers = #tpu.dot_dimension_numbers<[1], [0], [0], [1], [0, 0, 1, 1], [], []>} : vector<16x32xf32>, vector<32x32xf32>, vector<16x32xf32> -> vector<16x32xf32>
    %c0_22 = arith.constant 0 : index
    %c0_23 = arith.constant 0 : index
    %101 = vector.load %arg6[%c0_22, %c0_23] : memref<1x32xf32, #tpu.memory_space<vmem>>, vector<1x32xf32>
    %102 = vector.broadcast %101 : vector<1x32xf32> to vector<16x32xf32>
    %103 = arith.addf %100, %102 : vector<16x32xf32>
    %104 = vector.shape_cast %103 : vector<16x32xf32> to vector<2x8x32xf32>
    %c0_24 = arith.constant 0 : index
    %c0_25 = arith.constant 0 : index
    %c0_26 = arith.constant 0 : index
    %105 = vector.load %arg7[%c0_24, %c0_25, %c0_26] : memref<2x8x32xf32, #tpu.memory_space<vmem>>, vector<2x8x32xf32>
    tpu.vector_store %arg7[%c0_24, %c0_25, %c0_26], %104 {strides = array<i32>} : memref<2x8x32xf32, #tpu.memory_space<vmem>>, vector<2x8x32xf32>,
    return
  }
  func.func @transform_0(%arg0: i32) -> (i32, i32, i32) {
    %c0_i32 = arith.constant 0 : i32
    %c0_i32_0 = arith.constant 0 : i32
    %c0_i32_1 = arith.constant 0 : i32
    return %arg0, %c0_i32, %c0_i32_0 : i32, i32, i32
  }
  func.func @transform_1(%arg0: i32) -> (i32, i32) {
    %c0_i32 = arith.constant 0 : i32
    %c0_i32_0 = arith.constant 0 : i32
    %c0_i32_1 = arith.constant 0 : i32
    return %c0_i32, %c0_i32_0 : i32, i32
  }
  func.func @transform_2(%arg0: i32) -> (i32, i32) {
    %c0_i32 = arith.constant 0 : i32
    %c0_i32_0 = arith.constant 0 : i32
    %c0_i32_1 = arith.constant 0 : i32
    return %c0_i32, %c0_i32_0 : i32, i32
  }
  func.func @transform_3(%arg0: i32) -> (i32, i32) {
    %c0_i32 = arith.constant 0 : i32
    %c0_i32_0 = arith.constant 0 : i32
    %c0_i32_1 = arith.constant 0 : i32
    return %c0_i32, %c0_i32_0 : i32, i32
  }
  func.func @transform_4(%arg0: i32) -> (i32, i32) {
    %c0_i32 = arith.constant 0 : i32
    %c0_i32_0 = arith.constant 0 : i32
    %c0_i32_1 = arith.constant 0 : i32
    return %c0_i32, %c0_i32_0 : i32, i32
  }
  func.func @transform_5(%arg0: i32) -> (i32, i32) {
    %c0_i32 = arith.constant 0 : i32
    %c0_i32_0 = arith.constant 0 : i32
    %c0_i32_1 = arith.constant 0 : i32
    return %c0_i32, %c0_i32_0 : i32, i32
  }
  func.func @transform_6(%arg0: i32) -> (i32, i32, i32) {
    %c0_i32 = arith.constant 0 : i32
    %c0_i32_0 = arith.constant 0 : i32
    %c0_i32_1 = arith.constant 0 : i32
    return %arg0, %c0_i32, %c0_i32_0 : i32, i32, i32
  }
  func.func @transform_7(%arg0: i32) -> (i32, i32, i32, i32) {
    %c0_i32 = arith.constant 0 : i32
    %c0_i32_0 = arith.constant 0 : i32
    %c0_i32_1 = arith.constant 0 : i32
    %c0_i32_2 = arith.constant 0 : i32
    return %arg0, %c0_i32, %c0_i32_0, %c0_i32_1 : i32, i32, i32, i32
  }
}

</mosaic_0001>

<bundles_post_ra>
// kernel: tpu_custom_call.1
= control target key start
LH: loop header
LB: loop body
LE: loop exit
PB: predicated region body
PF: predicated region fallthrough
CT: control target
= control target key end

     0   :  { %13 = vsyncpa [#allocation3], 0  ;;  %s4375_s0 = inlined_call_operand.hbm [shape: f32[2,8,32], index: 0, kind: input, shape index: {}]   ;;  %s4376_s1 = inlined_call_operand.hbm [shape: f32[32,32], index: 1, kind: input, shape index: {}]   ;;  %s4377_s2 = inlined_call_operand.hbm [shape: f32[32,32], index: 2, kind: input, shape index: {}]   ;;  %s4378_s3 = inlined_call_operand.hbm [shape: f32[32,32], index: 3, kind: input, shape index: {}]   ;;  %s4379_s4 = inlined_call_operand.hbm [shape: f32[32,32], index: 4, kind: input, shape index: {}]   ;;  %s4380_s5 = inlined_call_operand.vmem [shape: f32[1,32], index: 5, kind: input, shape index: {}]   ;;  %s4381_s6 = inlined_call_operand.hbm [shape: f32[2,8,32], index: 6, kind: output, shape index: {0}]   ;;  %s4382_s7 = inlined_call_operand.hbm [shape: f32[2,8,8,8], index: 7, kind: output, shape index: {1}]  }
   0x1   :  { %14 = vsyncpa [#allocation6], 0 }
   0x2   :  { %15 = vsyncpa [#allocation9], 0 }
   0x3   :  { %16 = vsyncpa [#allocation4], 0 }
   0x4   :  { %17 = vsyncpa [#allocation13], 0  ;;  %s3798_s24 = smov [#allocation5]   ;;  %s3799_s26 = smov [#allocation8]  }
   0x5   :  { %s35_s25 = sshll.u32 %s3798_s24, 4  ;;  %s59_s27 = sshll.u32 %s3799_s26, 4  ;;  %s36_s25 = int_to_ptr.vmem [resolvable:$true] %s35_s25  ;;  %s60_s27 = int_to_ptr.vmem [resolvable:$true] %s59_s27 }
   0x6   :  { %s3656_s28 = scalar_lea.vmem %s36_s25, 512  ;;  %p3661_p1 = scmp.lt.s32.totalorder %s36_s25, %s36_s25 }
   0x7   :  { %p3657_p0 = scmp.ne.s32.totalorder %s36_s25, %s3656_s28  ;;  %p3662_p2 = scmp.lt.s32.totalorder %s3656_s28, %s3656_s28 }
   0x9   :  { %p3663_p3 = por %p3662_p2, %p3661_p1 }
   0xb   :  { %p3664_p4 = pnand %p3663_p3, %p3657_p0 }
   0xd   :  { %3667 = shalt.err (!%p3664_p4)
}
   0xe   :  { %s3800_s29 = smov 128   ;;  %s3801_s30 = smov 8  }
   0xf   :  { %41 = dma.hbm_to_vmem [thread:$0]  %s4376_s1, 512, %s36_s25, [#allocation6], %s3800_s29, %s3800_s29, %s3801_s30  }
  0x10   :  { %s3676_s10 = scalar_lea.vmem %s60_s27, 512  ;;  %p3681_p6 = scmp.lt.s32.totalorder %s60_s27, %s60_s27 }
  0x11   :  { %p3677_p5 = scmp.ne.s32.totalorder %s60_s27, %s3676_s10  ;;  %p3682_p7 = scmp.lt.s32.totalorder %s3676_s10, %s3676_s10 }
  0x13   :  { %p3683_p8 = por %p3682_p7, %p3681_p6 }
  0x15   :  { %p3684_p9 = pnand %p3683_p8, %p3677_p5 }
  0x17   :  { %3687 = shalt.err (!%p3684_p9)
}
  0x18   :  { %65 = dma.hbm_to_vmem [thread:$0]  %s4378_s3, 512, %s60_s27, [#allocation9], %s3800_s29, %s3800_s29, %s3801_s30  }
  0x19   :  { %s3802_s13 = smov [#allocation2]   ;;  %s3803_s15 = smov [#allocation7]  }
  0x1a   :  { %s23_s14 = sshll.u32 %s3802_s13, 4  ;;  %s47_s16 = sshll.u32 %s3803_s15, 4  ;;  %s24_s14 = int_to_ptr.vmem [resolvable:$true] %s23_s14  ;;  %s48_s16 = int_to_ptr.vmem [resolvable:$true] %s47_s16 }
  0x1b   :  { %s3696_s1 = scalar_lea.vmem %s24_s14, 256  ;;  %p3701_p11 = scmp.lt.s32.totalorder %s24_s14, %s24_s14 }
  0x1c   :  { %p3697_p10 = scmp.ne.s32.totalorder %s24_s14, %s3696_s1  ;;  %p3702_p12 = scmp.lt.s32.totalorder %s3696_s1, %s3696_s1 }
  0x1e   :  { %p3703_p13 = por %p3702_p12, %p3701_p11 }
  0x20   :  { %p3704_p0 = pnand %p3703_p13, %p3697_p10 }
  0x22   :  { %3707 = shalt.err (!%p3704_p0)
}
  0x23   :  { %29 = dma.hbm_to_vmem [thread:$0]  %s4375_s0, 256, %s24_s14, [#allocation3], %s3800_s29, %s3800_s29, %s3801_s30  }
  0x24   :  { %s3716_s3 = scalar_lea.vmem %s48_s16, 512  ;;  %p3721_p2 = scmp.lt.s32.totalorder %s48_s16, %s48_s16 }
  0x25   :  { %p3717_p1 = scmp.ne.s32.totalorder %s48_s16, %s3716_s3  ;;  %p3722_p3 = scmp.lt.s32.totalorder %s3716_s3, %s3716_s3 }
  0x27   :  { %p3723_p4 = por %p3722_p3, %p3721_p2 }
  0x29   :  { %p3724_p5 = pnand %p3723_p4, %p3717_p1 }
  0x2b   :  { %3727 = shalt.err (!%p3724_p5)
}
  0x2c   :  { %53 = dma.hbm_to_vmem [thread:$0]  %s4377_s2, 512, %s48_s16, [#allocation6], %s3800_s29, %s3800_s29, %s3801_s30  }
  0x2d   :  { %s3804_s21 = smov [#allocation10]  }
  0x2e   :  { %s71_s22 = sshll.u32 %s3804_s21, 4  ;;  %s72_s22 = int_to_ptr.vmem [resolvable:$true] %s71_s22 }
  0x2f   :  { %s3736_s23 = scalar_lea.vmem %s72_s22, 512  ;;  %p3741_p7 = scmp.lt.s32.totalorder %s72_s22, %s72_s22 }
  0x30   :  { %p3737_p6 = scmp.ne.s32.totalorder %s72_s22, %s3736_s23  ;;  %p3742_p8 = scmp.lt.s32.totalorder %s3736_s23, %s3736_s23 }
  0x32   :  { %p3743_p9 = por %p3742_p8, %p3741_p7 }
  0x34   :  { %p3744_p10 = pnand %p3743_p9, %p3737_p6 }
  0x36   :  { %3747 = shalt.err (!%p3744_p10)
}
  0x37   :  { %77 = dma.hbm_to_vmem [thread:$0]  %s4379_s4, 512, %s72_s22, [#allocation9], %s3800_s29, %s3800_s29, %s3801_s30  }
  0x38   :  { %3788 = dma.done.wait [#allocation3], 256  }
  0x39   :  { %3789 = vsyncadd [#allocation3], 4294967040 }
  0x3a   :  { %3790 = dma.done.wait [#allocation6], 1024  }
  0x3b   :  { %3791 = vsyncadd [#allocation6], 4294966272 }
  0x3c   :  { %3792 = dma.done.wait [#allocation9], 1024  }
  0x3d   :  { %3793 = vsyncadd [#allocation9], 4294966272  ;;  %v100_v0 = vld [vmem:[#allocation5 + $0x18] sm:$0xff]  ;;  %v99_v2 = vld [vmem:[#allocation5 + $0x10] sm:$0xff]  ;;  %vm101_vm0 = vcmask 261120   ;;  %v3805_v14 = vmov 0.0  }
  0x3e   :  { %v186_v1 = vld [vmem:[#allocation7 + $0x18] sm:$0xff]  ;;  %3356 = vmatprep.subr.mxu0 %v100_v0  ;;  %v185_v3 = vld [vmem:[#allocation7 + $0x10] sm:$0xff]  ;;  %v98_v4 = vld [vmem:[#allocation5 + $0x8] sm:$0xff]  ;;  %vm3806_vm1 = vmmov 0   ;;  %vm445_vm2 = vcmask 31744   ;;  %s3807_s2 = smov 124  }
  0x3f   :  { %3367 = vmatprep.subr.mxu1 %v186_v1  ;;  %3357 = vmatpush3.msra.mxu0 %v100_v0  ;;  %v184_v5 = vld [vmem:[#allocation7 + $0x8] sm:$0xff]  ;;  %v97_v6 = vld [vmem:[#allocation5] sm:$0xff]  ;;  %v95_v8 = vld [vmem:[#allocation2] sm:$0xff]  ;;  %s3808_s4 = smov 120   ;;  %s3809_s25 = smov 116   ;;  %vm1646_vm3 = vcmask 64512  }
  0x40   :  { %3368 = vmatpush3.msra.mxu1 %v186_v1  ;;  %3358 = vmatprep.subr.mxu0 %v99_v2  ;;  %v183_v7 = vld [vmem:[#allocation7] sm:$0xff]  ;;  %v96_v9 = vld [vmem:[#allocation2 + $0x8] sm:$0xff]  ;;  %v264_v11 = vld [vmem:[#allocation8 + $0x10] sm:$0xff]  ;;  %s3810_s26 = smov 108   ;;  %s3811_s27 = smov 112   ;;  %vm3067_vm4 = vcmask 97280  }
  0x41   :  { %3369 = vmatprep.subr.mxu1 %v185_v3  ;;  %3359 = vmatpush3.msra.mxu0 %v99_v2  ;;  %v265_v10 = vld [vmem:[#allocation8 + $0x18] sm:$0xff]  ;;  %v263_v12 = vld [vmem:[#allocation8 + $0x8] sm:$0xff]  ;;  %v262_v13 = vld [vmem:[#allocation8] sm:$0xff]  ;;  %s3812_s28 = smov 100   ;;  %s3813_s8 = smov 104   ;;  %vm3070_vm5 = vcmask 130048  }
  0x42   :  { %3370 = vmatpush3.msra.mxu1 %v185_v3  ;;  %3360 = vmatprep.subr.mxu0 %v98_v4  ;;  %s3814_s9 = smov 4   ;;  %s3815_s10 = smov 12   ;;  %vm3073_vm6 = vcmask 162816   ;;  %vm3076_vm7 = vcmask 195584   ;;  %vm3079_vm8 = vcmask 228352  }
  0x43   :  { %3371 = vmatprep.subr.mxu1 %v184_v5  ;;  %3361 = vmatpush3.msra.mxu0 %v98_v4  ;;  %s3816_s11 = smov 16   ;;  %s3817_s12 = smov 20  }
  0x44   :  { %3372 = vmatpush3.msra.mxu1 %v184_v5  ;;  %3362 = vmatprep.subr.mxu0 %v97_v6  ;;  %s3818_s13 = smov 24   ;;  %s3819_s14 = smov 28  }
  0x45   :  { %3373 = vmatprep.subr.mxu1 %v183_v7  ;;  %3363 = vmatpush3.msra.mxu0 %v97_v6  ;;  %s3820_s15 = smov [#allocation12]  }
  0x46   :  { %3364 = vmatprep.mubr.msk.f32.mxu0 %vm101_vm0, %v95_v8  ;;  %3374 = vmatpush3.msra.mxu1 %v183_v7  ;;  %s3193_s16 = sshll.u32 %s3820_s15, 4  ;;  %s3194_s16 = int_to_ptr.vmem [resolvable:$true] %s3193_s16 }
  0x47   :  { %3375 = vmatprep.mubr.msk.f32.mxu1 %vm101_vm0, %v95_v8  ;;  %3365 = vmatmul.mubr.msk.f32.vlgmr.msra.gmra.mxu0 %vm101_vm0, %v96_v9  ;;  %s3748_s1 = scalar_lea.vmem %s3194_s16, 2048  ;;  %p3753_p12 = scmp.lt.s32.totalorder %s3194_s16, %s3194_s16 }
  0x48   :  { %3376 = vmatmul.mubr.msk.f32.vlgmr.msra.gmra.mxu1 %vm101_vm0, %v96_v9  ;;  %3378 = vmatprep.subr.mxu0 %v265_v10  ;;  %p3749_p11 = scmp.ne.s32.totalorder %s3194_s16, %s3748_s1  ;;  %p3754_p13 = scmp.lt.s32.totalorder %s3748_s1, %s3748_s1 }
  0x49   :  { %3386 = vmatprep.mubr.msk.f32.mxu0 %vm101_vm0, %v95_v8  ;;  %3379 = vmatpush3.msra.mxu0 %v265_v10 }
  0x4a   :  { %3380 = vmatprep.subr.mxu0 %v264_v11  ;;  %3389 = vmatprep.subr.mxu1 %v3805_v14  ;;  %p3755_p0 = por %p3754_p13, %p3753_p12 }
  0x4b   :  { %3381 = vmatpush3.msra.mxu0 %v264_v11  ;;  %3391 = vmatprep.mubr.msk.f32.mxu1 %vm3806_vm1, %v3805_v14 }
  0x4c   :  { %3382 = vmatprep.subr.mxu0 %v263_v12  ;;  %p3756_p1 = pnand %p3755_p0, %p3749_p11 }
  0x4d   :  { %3383 = vmatpush3.msra.mxu0 %v263_v12 }
  0x4e   :  { %3384 = vmatprep.subr.mxu0 %v262_v13 }
  0x4f   :  { %3385 = vmatpush3.msra.mxu0 %v262_v13 }
  0x50   :  { %3387 = vmatmul.mubr.msk.f32.vlgmr.msra.gmra.mxu0 %vm101_vm0, %v96_v9  ;;  %3409 = vmatprep.subr.mxu0 %v3805_v14 }
  0x51   :  { %3411 = vmatprep.mubr.msk.f32.mxu0 %vm3806_vm1, %v3805_v14 }
 0x107   :  { %v3904_v15 = vpop.f32.mrf.mxu0 }
 0x108   :  { %v3906_v16 = vpop.f32.mrf.mxu1  ;;  %345 = vrot.lane.b32.xlu1 %v3904_v15, %s3807_s2 }
 0x109   :  { %375 = vrot.lane.b32.xlu0 %v3906_v16, %s3807_s2  ;;  %v174_v18 = vpop.f32.mrf.mxu0 }
 0x10a   :  { %v253_v17 = vpop.f32.mrf.mxu1 }
 0x10b   :  { %3390 = vmatpush3.xpose.msk.msra.mxu1 %vm445_vm2, %v253_v17 }
 0x10c   :  { %3394 = vmatprep.subr.mxu1 %v3805_v14  ;;  %383 = vrot.lane.b32.xlu1 %v3906_v16, %s3809_s25 }
 0x10d   :  { %379 = vrot.lane.b32.xlu0 %v3906_v16, %s3808_s4 }
 0x10e   :  { %3392 = vmatmul.mubr.msk.f32.vlgmr.msra.gmra.mxu1 %vm445_vm2, %v174_v18 }
 0x10f   :  { %3396 = vmatprep.mubr.msk.f32.mxu1 %vm3806_vm1, %v3805_v14 }
 0x110   :  { %353 = vrot.lane.b32.xlu1 %v3904_v15, %s3809_s25  ;;  %v3951_v19 = vpop.f32.mrf.mxu0 }
 0x111   :  { %349 = vrot.lane.b32.xlu0 %v3904_v15, %s3808_s4 }
 0x112   :  { %v3957_v20 = vpop.f32.mrf.mxu0 }
 0x114   :  { %377 = vrot.lane.b32.xlu1 %v253_v17, %s3808_s4 }
 0x115   :  { %373 = vrot.lane.b32.xlu0 %v253_v17, %s3807_s2 }
 0x118   :  { %347 = vrot.lane.b32.xlu1 %v174_v18, %s3808_s4 }
 0x119   :  { %343 = vrot.lane.b32.xlu0 %v174_v18, %s3807_s2 }
 0x11c   :  { %351 = vrot.lane.b32.xlu1 %v174_v18, %s3809_s25 }
 0x11d   :  { %381 = vrot.lane.b32.xlu0 %v253_v17, %s3809_s25 }
 0x120   :  { %389 = vrot.lane.b32.xlu1 %v253_v17, %s3810_s26 }
 0x121   :  { %385 = vrot.lane.b32.xlu0 %v253_v17, %s3811_s27 }
 0x124   :  { %359 = vrot.lane.b32.xlu1 %v174_v18, %s3810_s26 }
 0x125   :  { %355 = vrot.lane.b32.xlu0 %v174_v18, %s3811_s27 }
 0x128   :  { %397 = vrot.lane.b32.xlu1 %v253_v17, %s3812_s28 }
 0x129   :  { %393 = vrot.lane.b32.xlu0 %v253_v17, %s3813_s8 }
 0x12c   :  { %367 = vrot.lane.b32.xlu1 %v174_v18, %s3812_s28 }
 0x12d   :  { %363 = vrot.lane.b32.xlu0 %v174_v18, %s3813_s8 }
 0x130   :  { %391 = vrot.lane.b32.xlu1 %v3906_v16, %s3810_s26 }
 0x131   :  { %387 = vrot.lane.b32.xlu0 %v3906_v16, %s3811_s27 }
 0x134   :  { %361 = vrot.lane.b32.xlu1 %v3904_v15, %s3810_s26 }
 0x135   :  { %357 = vrot.lane.b32.xlu0 %v3904_v15, %s3811_s27 }
 0x138   :  { %399 = vrot.lane.b32.xlu1 %v3906_v16, %s3812_s28 }
 0x139   :  { %395 = vrot.lane.b32.xlu0 %v3906_v16, %s3813_s8 }
 0x13c   :  { %369 = vrot.lane.b32.xlu1 %v3904_v15, %s3812_s28 }
 0x13d   :  { %365 = vrot.lane.b32.xlu0 %v3904_v15, %s3813_s8 }
 0x140   :  { %403 = vrot.lane.b32.xlu1 %v3957_v20, %s3807_s2 }
 0x141   :  { %409 = vrot.lane.b32.xlu0 %v3957_v20, %s3808_s4 }
 0x144   :  { %415 = vrot.lane.b32.xlu1 %v3957_v20, %s3809_s25 }
 0x145   :  { %439 = vrot.lane.b32.xlu0 %v3957_v20, %s3812_s28 }
 0x148   :  { %421 = vrot.lane.b32.xlu1 %v3957_v20, %s3811_s27 }
 0x14c   :  { %427 = vrot.lane.b32.xlu1 %v3957_v20, %s3810_s26 }
 0x150   :  { %433 = vrot.lane.b32.xlu1 %v3957_v20, %s3813_s8 }
 0x17a   :  { %v346_v22 = vpop.permute.xlu1 %345 }
 0x17b   :  { %v376_v21 = vpop.permute.xlu0 %375 }
 0x17e   :  { %v384_v24 = vpop.permute.xlu1 %383 }
 0x17f   :  { %v380_v23 = vpop.permute.xlu0 %379 }
 0x182   :  { %v354_v26 = vpop.permute.xlu1 %353 }
 0x183   :  { %v350_v25 = vpop.permute.xlu0 %349 }
 0x186   :  { %v378_v28 = vpop.permute.xlu1 %377 }
 0x187   :  { %v374_v27 = vpop.permute.xlu0 %373 }
 0x188   :  { %3395 = vmatpush3.xpose.msk.msra.mxu1 %vm445_vm2, %v374_v27 }
 0x189   :  { %3399 = vmatprep.subr.mxu1 %v3805_v14 }
 0x18a   :  { %v348_v29 = vpop.permute.xlu1 %347 }
 0x18b   :  { %v344_v30 = vpop.permute.xlu0 %343 }
 0x18c   :  { %3397 = vmatmul.mubr.msk.f32.vlgmr.msra.gmra.mxu1 %vm445_vm2, %v344_v30 }
 0x18d   :  { %3400 = vmatpush3.xpose.msk.msra.mxu1 %vm445_vm2, %v378_v28  ;;  %3401 = vmatprep.mubr.msk.f32.mxu1 %vm3806_vm1, %v3805_v14 }
 0x18e   :  { %3404 = vmatprep.subr.mxu1 %v3805_v14  ;;  %v352_v31 = vpop.permute.xlu1 %351 }
 0x18f   :  { %v382_v32 = vpop.permute.xlu0 %381 }
 0x190   :  { %3402 = vmatmul.mubr.msk.f32.vlgmr.msra.gmra.mxu1 %vm445_vm2, %v348_v29 }
 0x191   :  { %3405 = vmatpush3.xpose.msk.msra.mxu1 %vm445_vm2, %v382_v32  ;;  %3406 = vmatprep.mubr.msk.f32.mxu1 %vm3806_vm1, %v3805_v14 }
 0x192   :  { %3414 = vmatprep.subr.mxu1 %v3805_v14  ;;  %v390_v33 = vpop.permute.xlu1 %389 }
 0x193   :  { %v386_v34 = vpop.permute.xlu0 %385 }
 0x194   :  { %3407 = vmatmul.mubr.msk.f32.vlgmr.msra.gmra.mxu1 %vm445_vm2, %v352_v31  ;;  %3410 = vmatpush3.xpose.msk.msra.mxu0 %vm445_vm2, %v386_v34 }
 0x195   :  { %3415 = vmatpush3.xpose.msk.msra.mxu1 %vm445_vm2, %v390_v33  ;;  %3416 = vmatprep.mubr.msk.f32.mxu1 %vm3806_vm1, %v3805_v14 }
 0x196   :  { %3419 = vmatprep.subr.mxu0 %v3805_v14  ;;  %3424 = vmatprep.subr.mxu1 %v3805_v14  ;;  %v360_v35 = vpop.permute.xlu1 %359 }
 0x197   :  { %v356_v36 = vpop.permute.xlu0 %355 }
 0x198   :  { %3412 = vmatmul.mubr.msk.f32.vlgmr.msra.gmra.mxu0 %vm445_vm2, %v356_v36  ;;  %3417 = vmatmul.mubr.msk.f32.vlgmr.msra.gmra.mxu1 %vm445_vm2, %v360_v35 }
 0x199   :  { %3421 = vmatprep.mubr.msk.f32.mxu0 %vm3806_vm1, %v3805_v14  ;;  %3426 = vmatprep.mubr.msk.f32.mxu1 %vm3806_vm1, %v3805_v14 }
 0x19a   :  { %v398_v37 = vpop.permute.xlu1 %397 }
 0x19b   :  { %v394_v38 = vpop.permute.xlu0 %393  ;;  %3425 = vmatpush3.xpose.msk.msra.mxu1 %vm445_vm2, %v398_v37 }
 0x19c   :  { %3420 = vmatpush3.xpose.msk.msra.mxu0 %vm445_vm2, %v394_v38  ;;  %3434 = vmatprep.subr.mxu1 %v3805_v14 }
 0x19d   :  { %3429 = vmatprep.subr.mxu0 %v3805_v14 }
 0x19e   :  { %v368_v39 = vpop.permute.xlu1 %367 }
 0x19f   :  { %v364_v40 = vpop.permute.xlu0 %363  ;;  %3427 = vmatmul.mubr.msk.f32.vlgmr.msra.gmra.mxu1 %vm445_vm2, %v368_v39 }
 0x1a0   :  { %3422 = vmatmul.mubr.msk.f32.vlgmr.msra.gmra.mxu0 %vm445_vm2, %v364_v40  ;;  %3435 = vmatpush3.xpose.msk.msra.mxu1 %vm445_vm2, %v376_v21 }
 0x1a1   :  { %3430 = vmatpush3.xpose.msk.msra.mxu0 %vm445_vm2, %v3906_v16  ;;  %3431 = vmatprep.mubr.msk.f32.mxu0 %vm3806_vm1, %v3805_v14 }
 0x1a2   :  { %3439 = vmatprep.subr.mxu0 %v3805_v14  ;;  %v392_v41 = vpop.permute.xlu1 %391  ;;  %3436 = vmatprep.mubr.msk.f32.mxu1 %vm3806_vm1, %v3805_v14 }
 0x1a3   :  { %v388_v42 = vpop.permute.xlu0 %387  ;;  %3444 = vmatprep.subr.mxu1 %v3805_v14  ;;  %3437 = vmatmul.mubr.msk.f32.vlgmr.msra.gmra.mxu1 %vm445_vm2, %v346_v22 }
 0x1a4   :  { %3432 = vmatmul.mubr.msk.f32.vlgmr.msra.gmra.mxu0 %vm445_vm2, %v3904_v15  ;;  %3445 = vmatpush3.xpose.msk.msra.mxu1 %vm445_vm2, %v384_v24 }
 0x1a5   :  { %3440 = vmatpush3.xpose.msk.msra.mxu0 %vm445_vm2, %v380_v23  ;;  %3441 = vmatprep.mubr.msk.f32.mxu0 %vm3806_vm1, %v3805_v14 }
 0x1a6   :  { %3449 = vmatprep.subr.mxu0 %v3805_v14  ;;  %v362_v43 = vpop.permute.xlu1 %361  ;;  %3446 = vmatprep.mubr.msk.f32.mxu1 %vm3806_vm1, %v3805_v14 }
 0x1a7   :  { %v358_v44 = vpop.permute.xlu0 %357  ;;  %3454 = vmatprep.subr.mxu1 %v3805_v14  ;;  %3447 = vmatmul.mubr.msk.f32.vlgmr.msra.gmra.mxu1 %vm445_vm2, %v354_v26 }
 0x1a8   :  { %3442 = vmatmul.mubr.msk.f32.vlgmr.msra.gmra.mxu0 %vm445_vm2, %v350_v25  ;;  %3455 = vmatpush3.xpose.msk.msra.mxu1 %vm445_vm2, %v392_v41 }
 0x1a9   :  { %3450 = vmatpush3.xpose.msk.msra.mxu0 %vm445_vm2, %v388_v42  ;;  %3451 = vmatprep.mubr.msk.f32.mxu0 %vm3806_vm1, %v3805_v14 }
 0x1aa   :  { %3459 = vmatprep.subr.mxu0 %v3805_v14  ;;  %v400_v45 = vpop.permute.xlu1 %399  ;;  %3456 = vmatprep.mubr.msk.f32.mxu1 %vm3806_vm1, %v3805_v14 }
 0x1ab   :  { %v396_v46 = vpop.permute.xlu0 %395  ;;  %3464 = vmatprep.subr.mxu1 %v3805_v14  ;;  %3457 = vmatmul.mubr.msk.f32.vlgmr.msra.gmra.mxu1 %vm445_vm2, %v362_v43 }
 0x1ac   :  { %3452 = vmatmul.mubr.msk.f32.vlgmr.msra.gmra.mxu0 %vm445_vm2, %v358_v44  ;;  %3465 = vmatpush3.xpose.msk.msra.mxu1 %vm445_vm2, %v400_v45 }
 0x1ad   :  { %3460 = vmatpush3.xpose.msk.msra.mxu0 %vm445_vm2, %v396_v46  ;;  %3461 = vmatprep.mubr.msk.f32.mxu0 %vm3806_vm1, %v3805_v14 }
 0x1ae   :  { %3466 = vmatprep.mubr.msk.f32.mxu1 %vm3806_vm1, %v3805_v14  ;;  %v370_v47 = vpop.permute.xlu1 %369  ;;  %3469 = vmatprep.subr.mxu0 %v3805_v14 }
 0x1af   :  { %v366_v48 = vpop.permute.xlu0 %365  ;;  %3474 = vmatprep.subr.mxu1 %v3805_v14  ;;  %3467 = vmatmul.mubr.msk.f32.vlgmr.msra.gmra.mxu1 %vm445_vm2, %v370_v47 }
 0x1b0   :  { %3462 = vmatmul.mubr.msk.f32.vlgmr.msra.gmra.mxu0 %vm445_vm2, %v366_v48  ;;  %3476 = vmatprep.mubr.msk.f32.mxu1 %vm3806_vm1, %v3805_v14 }
 0x1b1   :  { %3470 = vmatpush3.msra.mxu0 %v3957_v20  ;;  %3471 = vmatprep.mubr.msk.f32.mxu0 %vm3806_vm1, %v3805_v14 }
 0x1b2   :  { %3479 = vmatprep.subr.mxu0 %v3805_v14  ;;  %v404_v53 = vpop.permute.xlu1 %403 }
 0x1b3   :  { %3475 = vmatpush3.msra.mxu1 %v404_v53  ;;  %v4123_v53 = vpop.permute.xlu0 %409 }
 0x1b4   :  { %3484 = vmatprep.subr.mxu1 %v3805_v14 }
 0x1ce   :  { %v516_v49 = vpop.f32.mrf.mxu1 }
 0x1cf   :  { %v4052_v50 = vmul.f32 0.5, %v516_v49 }
 0x1d0   :  { %v3393_v51 = vpop.f32.mrf.mxu1 }
 0x1d1   :  { %v1647_v52 = vsel %vm1646_vm3, %v4052_v50, -inf }
 0x1d2   :  { %1648 = vmax.xlane.f32.xlu0 %v1647_v52 }
 0x1e8   :  { %411 = vrot.lane.b32.xlu0 %v3951_v19, %s3808_s4 }
 0x24c   :  { %v590_v54 = vpop.f32.mrf.mxu1 }
 0x24d   :  { %v4059_v55 = vmul.f32 0.5, %v590_v54  ;;  %v4129_v54 = vpop.permute.xlu0 %439 }
 0x24e   :  { %v3398_v56 = vpop.f32.mrf.mxu1 }
 0x24f   :  { %v1650_v57 = vsel %vm1646_vm3, %v4059_v55, -inf }
 0x250   :  { %v664_v58 = vpop.f32.mrf.mxu1  ;;  %1651 = vmax.xlane.f32.xlu1 %v1650_v57 }
 0x251   :  { %v4063_v59 = vmul.f32 0.5, %v664_v58 }
 0x252   :  { %v3403_v60 = vpop.f32.mrf.mxu1 }
 0x253   :  { %v1653_v61 = vsel %vm1646_vm3, %v4063_v59, -inf  ;;  %v4132_v60 = vpop.permute.xlu1 %415 }
 0x254   :  { %v738_v62 = vpop.f32.mrf.mxu1  ;;  %1654 = vmax.xlane.f32.xlu0 %v1653_v61 }
 0x255   :  { %v4067_v63 = vmul.f32 0.5, %v738_v62 }
 0x256   :  { %v3408_v0 = vpop.f32.mrf.mxu1 }
 0x257   :  { %v1656_v1 = vsel %vm1646_vm3, %v4067_v63, -inf  ;;  %v4134_v61 = vpop.permute.xlu1 %421 }
 0x258   :  { %v886_v2 = vpop.f32.mrf.mxu1  ;;  %1657 = vmax.xlane.f32.xlu0 %v1656_v1  ;;  %v812_v3 = vpop.f32.mrf.mxu0 }
 0x259   :  { %v4071_v4 = vmul.f32 0.5, %v886_v2  ;;  %v4097_v40 = vmul.f32 0.5, %v812_v3 }
 0x25a   :  { %v3413_v5 = vpop.f32.mrf.mxu0  ;;  %v3418_v6 = vpop.f32.mrf.mxu1 }
 0x25b   :  { %v1662_v7 = vsel %vm1646_vm3, %v4071_v4, -inf  ;;  %v1659_v42 = vsel %vm1646_vm3, %v4097_v40, -inf  ;;  %v1649_v56 = vpop.xlane.xlu0 %1648  ;;  %v4138_v0 = vpop.permute.xlu1 %427 }
 0x25c   :  { %1663 = vmax.xlane.f32.xlu0 %v1662_v7  ;;  %v1695_v57 = vsub.f32 %v4052_v50, %v1649_v56 }
 0x25e   :  { %v1711_v58 = vmul.f32 1.442695, %v1695_v57 }
 0x25f   :  { %v1034_v9 = vpop.f32.mrf.mxu1  ;;  %v4142_v2 = vpop.permute.xlu1 %433 }
 0x260   :  { %v960_v8 = vpop.f32.mrf.mxu0  ;;  %v4075_v10 = vmul.f32 0.5, %v1034_v9  ;;  %3584 = vpow2.f32 %v1711_v58  ;;  %v4144_v3 = vpop.permute.xlu0 %411 }
 0x261   :  { %405 = vrot.lane.b32.xlu1 %v3951_v19, %s3807_s2  ;;  %v3428_v12 = vpop.f32.mrf.mxu1  ;;  %v4099_v41 = vmul.f32 0.5, %v960_v8 }
 0x262   :  { %v3423_v11 = vpop.f32.mrf.mxu0  ;;  %v1668_v13 = vsel %vm1646_vm3, %v4075_v10, -inf }
 0x263   :  { %v1182_v15 = vpop.f32.mrf.mxu1  ;;  %1669 = vmax.xlane.f32.xlu0 %v1668_v13  ;;  %v1665_v44 = vsel %vm1646_vm3, %v4099_v41, -inf }
 0x264   :  { %v1108_v16 = vpop.f32.mrf.mxu0  ;;  %v4081_v17 = vmul.f32 0.5, %v1182_v15 }
 0x265   :  { %v3438_v20 = vpop.f32.mrf.mxu1  ;;  %v4103_v43 = vmul.f32 0.5, %v1108_v16 }
 0x266   :  { %v3433_v18 = vpop.f32.mrf.mxu0  ;;  %v1674_v21 = vsel %vm1646_vm3, %v4081_v17, -inf }
 0x267   :  { %v1330_v22 = vpop.f32.mrf.mxu1  ;;  %1675 = vmax.xlane.f32.xlu0 %v1674_v21  ;;  %v1671_v46 = vsel %vm1646_vm3, %v4103_v43, -inf }
 0x268   :  { %v1256_v23 = vpop.f32.mrf.mxu0  ;;  %v4085_v24 = vmul.f32 0.5, %v1330_v22 }
 0x269   :  { %v3448_v26 = vpop.f32.mrf.mxu1  ;;  %v4109_v45 = vmul.f32 0.5, %v1256_v23 }
 0x26a   :  { %v3443_v25 = vpop.f32.mrf.mxu0  ;;  %v1680_v27 = vsel %vm1646_vm3, %v4085_v24, -inf }
 0x26b   :  { %v1478_v28 = vpop.f32.mrf.mxu1  ;;  %1681 = vmax.xlane.f32.xlu0 %v1680_v27  ;;  %v1677_v48 = vsel %vm1646_vm3, %v4109_v45, -inf }
 0x26c   :  { %v1404_v29 = vpop.f32.mrf.mxu0  ;;  %v4089_v30 = vmul.f32 0.5, %v1478_v28 }
 0x26d   :  { %v3458_v32 = vpop.f32.mrf.mxu1  ;;  %v4113_v47 = vmul.f32 0.5, %v1404_v29  ;;  %v4136_v62 = vpop.eup %3584 }
 0x26e   :  { %v3453_v31 = vpop.f32.mrf.mxu0  ;;  %v1686_v33 = vsel %vm1646_vm3, %v4089_v30, -inf  ;;  %v1743_v1 = vsel %vm1646_vm3, %v4136_v62, 0.0 }
 0x26f   :  { %v1626_v34 = vpop.f32.mrf.mxu1  ;;  %1687 = vmax.xlane.f32.xlu0 %v1686_v33  ;;  %v1683_v51 = vsel %vm1646_vm3, %v4113_v47, -inf }
 0x270   :  { %v1552_v35 = vpop.f32.mrf.mxu0  ;;  %v4093_v36 = vmul.f32 0.5, %v1626_v34 }
 0x271   :  { %v3468_v38 = vpop.f32.mrf.mxu1  ;;  %v4117_v49 = vmul.f32 0.5, %v1552_v35 }
 0x272   :  { %v3463_v37 = vpop.f32.mrf.mxu0  ;;  %v1692_v39 = vsel %vm1646_vm3, %v4093_v36, -inf }
 0x273   :  { %1693 = vmax.xlane.f32.xlu0 %v1692_v39  ;;  %v1689_v52 = vsel %vm1646_vm3, %v4117_v49, -inf }
 0x285   :  { %1660 = vmax.xlane.f32.xlu1 %v1659_v42 }
 0x289   :  { %1666 = vmax.xlane.f32.xlu1 %v1665_v44  ;;  %423 = vrot.lane.b32.xlu0 %v3951_v19, %s3811_s27 }
 0x28d   :  { %1672 = vmax.xlane.f32.xlu1 %v1671_v46 }
 0x291   :  { %1678 = vmax.xlane.f32.xlu1 %v1677_v48 }
 0x295   :  { %1684 = vmax.xlane.f32.xlu1 %v1683_v51 }
 0x299   :  { %1690 = vmax.xlane.f32.xlu1 %v1689_v52 }
 0x2aa   :  { %417 = vrot.lane.b32.xlu1 %v3951_v19, %s3809_s25 }
 0x2ae   :  { %429 = vrot.lane.b32.xlu1 %v3951_v19, %s3810_s26 }
 0x2d2   :  { %1744 = vadd.xlane.f32.xlu1 %v1743_v1 }
 0x2d9   :  { %v1652_v5 = vpop.xlane.xlu1 %1651 }
 0x2da   :  { %v1696_v50 = vsub.f32 %v4059_v55, %v1652_v5 }
 0x2dc   :  { %v1713_v6 = vmul.f32 1.442695, %v1696_v50 }
 0x2dd   :  { %v1655_v7 = vpop.xlane.xlu0 %1654  ;;  %v4171_v31 = vpop.permute.xlu1 %405 }
 0x2de   :  { %3586 = vpow2.f32 %v1713_v6  ;;  %v1697_v32 = vsub.f32 %v4063_v59, %v1655_v7 }
 0x2e0   :  { %v1715_v35 = vmul.f32 1.442695, %v1697_v32 }
 0x2e1   :  { %v1658_v8 = vpop.xlane.xlu0 %1657 }
 0x2e2   :  { %v1698_v9 = vsub.f32 %v4067_v63, %v1658_v8 }
 0x2e4   :  { %v1717_v11 = vmul.f32 1.442695, %v1698_v9 }
 0x2e5   :  { %v1664_v12 = vpop.xlane.xlu0 %1663 }
 0x2e6   :  { %3588 = vpow2.f32 %v1717_v11  ;;  %v1700_v13 = vsub.f32 %v4071_v4, %v1664_v12 }
 0x2e8   :  { %v1721_v15 = vmul.f32 1.442695, %v1700_v13 }
 0x2ea   :  { %3590 = vpow2.f32 %v1721_v15 }
 0x2eb   :  { %v4149_v16 = vpop.eup %3586 }
 0x2ec   :  { %v1746_v18 = vsel %vm1646_vm3, %v4149_v16, 0.0  ;;  %v1670_v20 = vpop.xlane.xlu0 %1669 }
 0x2ed   :  { %1747 = vadd.xlane.f32.xlu0 %v1746_v18  ;;  %v1702_v55 = vsub.f32 %v4075_v10, %v1670_v20 }
 0x2ef   :  { %v1725_v21 = vmul.f32 1.442695, %v1702_v55 }
 0x2f0   :  { %v1676_v22 = vpop.xlane.xlu0 %1675 }
 0x2f1   :  { %3592 = vpow2.f32 %v1725_v21  ;;  %v1704_v63 = vsub.f32 %v4081_v17, %v1676_v22 }
 0x2f3   :  { %v4155_v23 = vpop.eup %3588  ;;  %v1729_v25 = vmul.f32 1.442695, %v1704_v63 }
 0x2f4   :  { %v1752_v4 = vsel %vm1646_vm3, %v4155_v23, 0.0  ;;  %v1682_v51 = vpop.xlane.xlu0 %1681 }
 0x2f5   :  { %1753 = vadd.xlane.f32.xlu0 %v1752_v4  ;;  %3594 = vpow2.f32 %v1729_v25  ;;  %v1706_v5 = vsub.f32 %v4085_v24, %v1682_v51 }
 0x2f7   :  { %v4159_v26 = vpop.eup %3590 }
 0x2f8   :  { %v1758_v27 = vsel %vm1646_vm3, %v4159_v26, 0.0  ;;  %v1688_v1 = vpop.xlane.xlu0 %1687 }
 0x2f9   :  { %1759 = vadd.xlane.f32.xlu0 %v1758_v27  ;;  %v1708_v8 = vsub.f32 %v4089_v30, %v1688_v1 }
 0x2fb   :  { %v1737_v12 = vmul.f32 1.442695, %v1708_v8 }
 0x2fc   :  { %v1694_v24 = vpop.xlane.xlu0 %1693 }
 0x2fd   :  { %v1710_v13 = vsub.f32 %v4093_v36, %v1694_v24 }
 0x2fe   :  { %v4163_v10 = vpop.eup %3592 }
 0x2ff   :  { %v1764_v28 = vsel %vm1646_vm3, %v4163_v10, 0.0  ;;  %v1741_v18 = vmul.f32 1.442695, %v1710_v13 }
 0x300   :  { %1765 = vadd.xlane.f32.xlu0 %v1764_v28 }
 0x302   :  { %v4167_v17 = vpop.eup %3594 }
 0x303   :  { %v1770_v29 = vsel %vm1646_vm3, %v4167_v17, 0.0 }
 0x304   :  { %1771 = vadd.xlane.f32.xlu0 %v1770_v29 }
 0x30e   :  { %v1661_v33 = vpop.xlane.xlu1 %1660 }
 0x30f   :  { %v1699_v34 = vsub.f32 %v4097_v40, %v1661_v33 }
 0x311   :  { %v1719_v37 = vmul.f32 1.442695, %v1699_v34 }
 0x312   :  { %v1667_v38 = vpop.xlane.xlu1 %1666 }
 0x313   :  { %3596 = vpow2.f32 %v1719_v37  ;;  %v1701_v39 = vsub.f32 %v4099_v41, %v1667_v38 }
 0x314   :  { %3598 = vpow2.f32 %v1715_v35 }
 0x315   :  { %v1723_v42 = vmul.f32 1.442695, %v1701_v39  ;;  %v4236_v39 = vpop.permute.xlu0 %423 }
 0x316   :  { %v1673_v44 = vpop.xlane.xlu1 %1672 }
 0x317   :  { %v1703_v46 = vsub.f32 %v4103_v43, %v1673_v44  ;;  %3600 = vpow2.f32 %v1723_v42 }
 0x319   :  { %v1727_v48 = vmul.f32 1.442695, %v1703_v46 }
 0x31a   :  { %v1679_v52 = vpop.xlane.xlu1 %1678 }
 0x31b   :  { %v1705_v59 = vsub.f32 %v4109_v45, %v1679_v52  ;;  %3602 = vpow2.f32 %v1727_v48 }
 0x31d   :  { %v1731_v56 = vmul.f32 1.442695, %v1705_v59 }
 0x31e   :  { %v1685_v40 = vpop.xlane.xlu1 %1684 }
 0x31f   :  { %v1707_v57 = vsub.f32 %v4113_v47, %v1685_v40  ;;  %3604 = vpow2.f32 %v1731_v56  ;;  %v1733_v47 = vmul.f32 1.442695, %v1706_v5 }
 0x320   :  { %v4179_v58 = vpop.eup %3596 }
 0x321   :  { %v4181_v41 = vpop.eup %3598  ;;  %v1735_v43 = vmul.f32 1.442695, %v1707_v57  ;;  %v1755_v50 = vsel %vm1646_vm3, %v4179_v58, 0.0 }
 0x322   :  { %1756 = vadd.xlane.f32.xlu1 %v1755_v50  ;;  %v1691_v6 = vpop.xlane.xlu1 %1690  ;;  %v1749_v7 = vsel %vm1646_vm3, %v4181_v41, 0.0 }
 0x323   :  { %v1709_v45 = vsub.f32 %v4117_v49, %v1691_v6  ;;  %3606 = vpow2.f32 %v1735_v43 }
 0x324   :  { %v4190_v11 = vpop.eup %3600 }
 0x325   :  { %v1739_v9 = vmul.f32 1.442695, %v1709_v45  ;;  %v1761_v49 = vsel %vm1646_vm3, %v4190_v11, 0.0 }
 0x326   :  { %1750 = vadd.xlane.f32.xlu1 %v1749_v7  ;;  %v418_v33 = vpop.permute.xlu1 %417 }
 0x327   :  { %3608 = vpow2.f32 %v1739_v9 }
 0x328   :  { %3610 = vpow2.f32 %v1733_v47  ;;  %v4195_v15 = vpop.eup %3602 }
 0x329   :  { %3612 = vpow2.f32 %v1737_v12  ;;  %v1767_v30 = vsel %vm1646_vm3, %v4195_v15, 0.0 }
 0x32a   :  { %1762 = vadd.xlane.f32.xlu1 %v1761_v49  ;;  %3614 = vpow2.f32 %v1741_v18  ;;  %v4225_v34 = vpop.permute.xlu1 %429 }
 0x32c   :  { %v4199_v20 = vpop.eup %3604 }
 0x32d   :  { %v1773_v55 = vsel %vm1646_vm3, %v4199_v20, 0.0 }
 0x32e   :  { %1768 = vadd.xlane.f32.xlu1 %v1767_v30 }
 0x330   :  { %v4203_v21 = vpop.eup %3606 }
 0x331   :  { %v1779_v22 = vsel %vm1646_vm3, %v4203_v21, 0.0 }
 0x332   :  { %1774 = vadd.xlane.f32.xlu1 %v1773_v55 }
 0x334   :  { %v4205_v36 = vpop.eup %3608 }
 0x335   :  { %v1785_v63 = vsel %vm1646_vm3, %v4205_v36, 0.0  ;;  %v4211_v25 = vpop.eup %3610 }
 0x336   :  { %1780 = vadd.xlane.f32.xlu1 %v1779_v22  ;;  %1786 = vadd.xlane.f32.xlu0 %v1785_v63  ;;  %v1776_v4 = vsel %vm1646_vm3, %v4211_v25, 0.0  ;;  %v4215_v27 = vpop.eup %3612 }
 0x337   :  { %v1782_v28 = vsel %vm1646_vm3, %v4215_v27, 0.0  ;;  %v4219_v29 = vpop.eup %3614 }
 0x338   :  { %v1788_v32 = vsel %vm1646_vm3, %v4219_v29, 0.0 }
 0x33a   :  { %1777 = vadd.xlane.f32.xlu0 %v1776_v4 }
 0x33e   :  { %1783 = vadd.xlane.f32.xlu0 %v1782_v28 }
 0x342   :  { %1789 = vadd.xlane.f32.xlu0 %v1788_v32 }
 0x347   :  { %441 = vrot.lane.b32.xlu1 %v3951_v19, %s3812_s28 }
 0x358   :  { %435 = vrot.lane.b32.xlu0 %v3951_v19, %s3813_s8 }
 0x35b   :  { %v1745_v35 = vpop.xlane.xlu1 %1744 }
 0x35c   :  { %3616 = vrcp.f32 %v1745_v35 }
 0x369   :  { %v3617_v37 = vpop.eup %3616 }
 0x36a   :  { %v1792_v38 = vmul.f32 %v3617_v37, %v4136_v62 }
 0x36c   :  { %1823 = vst.msk [vmem:[#allocation12] sm:$0xff] %vm1646_vm3, %v1792_v38  ;;  %3472 = vmatmul.mubr.msk.f32.vlgmr.msra.gmra.mxu0 %vm1646_vm3, %v1792_v38 }
 0x36d   :  { %3480 = vmatpush3.msra.mxu0 %v4123_v53  ;;  %3481 = vmatprep.mubr.msk.f32.mxu0 %vm3806_vm1, %v3805_v14 }
 0x36e   :  { %3489 = vmatprep.subr.mxu0 %v3805_v14 }
 0x376   :  { %v1748_v42 = vpop.xlane.xlu0 %1747 }
 0x377   :  { %3618 = vrcp.f32 %v1748_v42 }
 0x37e   :  { %v1754_v44 = vpop.xlane.xlu0 %1753 }
 0x37f   :  { %3620 = vrcp.f32 %v1754_v44 }
 0x382   :  { %v1760_v46 = vpop.xlane.xlu0 %1759 }
 0x383   :  { %3622 = vrcp.f32 %v1760_v46 }
 0x384   :  { %v3619_v62 = vpop.eup %3618 }
 0x385   :  { %v1794_v48 = vmul.f32 %v3619_v62, %v4149_v16 }
 0x387   :  { %1824 = vst.msk [vmem:[#allocation12 + $0x8] sm:$0xff] %vm1646_vm3, %v1794_v48  ;;  %3477 = vmatmul.mubr.msk.f32.vlgmr.msra.gmra.mxu1 %vm1646_vm3, %v1794_v48  ;;  %v3085_v48 = vld [vmem:[#allocation10 + $0x18] sm:$0xff] }
 0x388   :  { %3485 = vmatpush3.msra.mxu1 %v4132_v60  ;;  %3486 = vmatprep.mubr.msk.f32.mxu1 %vm3806_vm1, %v3805_v14 }
 0x389   :  { %3494 = vmatprep.subr.mxu1 %v3805_v14  ;;  %v1766_v53 = vpop.xlane.xlu0 %1765 }
 0x38a   :  { %3624 = vrcp.f32 %v1766_v53  ;;  %v3084_v53 = vld [vmem:[#allocation10 + $0x10] sm:$0xff] }
 0x38c   :  { %v3621_v51 = vpop.eup %3620 }
 0x38d   :  { %v1798_v52 = vmul.f32 %v3621_v51, %v4155_v23  ;;  %v1772_v59 = vpop.xlane.xlu0 %1771 }
 0x38e   :  { %3626 = vrcp.f32 %v1772_v59 }
 0x38f   :  { %1826 = vst.msk [vmem:[#allocation12 + $0x18] sm:$0xff] %vm1646_vm3, %v1798_v52  ;;  %3487 = vmatmul.mubr.msk.f32.vlgmr.msra.gmra.mxu1 %vm1646_vm3, %v1798_v52 }
 0x390   :  { %v3623_v16 = vpop.eup %3622  ;;  %3495 = vmatpush3.msra.mxu1 %v4138_v0  ;;  %3496 = vmatprep.mubr.msk.f32.mxu1 %vm3806_vm1, %v3805_v14 }
 0x391   :  { %3504 = vmatprep.subr.mxu1 %v3805_v14  ;;  %v1802_v60 = vmul.f32 %v3623_v16, %v4159_v26  ;;  %v3083_v16 = vld [vmem:[#allocation10 + $0x8] sm:$0xff] }
 0x393   :  { %1828 = vst.msk [vmem:[#allocation12 + $0x28] sm:$0xff] %vm1646_vm3, %v1802_v60  ;;  %3497 = vmatmul.mubr.msk.f32.vlgmr.msra.gmra.mxu1 %vm1646_vm3, %v1802_v60 }
 0x394   :  { %3505 = vmatpush3.msra.mxu1 %v4129_v54  ;;  %3506 = vmatprep.mubr.msk.f32.mxu1 %vm3806_vm1, %v3805_v14 }
 0x395   :  { %3514 = vmatprep.subr.mxu1 %v3805_v14 }
 0x397   :  { %v3625_v23 = vpop.eup %3624 }
 0x398   :  { %v1806_v0 = vmul.f32 %v3625_v23, %v4163_v10 }
 0x39a   :  { %1830 = vst.msk [vmem:[#allocation12 + $0x38] sm:$0xff] %vm1646_vm3, %v1806_v0  ;;  %3507 = vmatmul.mubr.msk.f32.vlgmr.msra.gmra.mxu1 %vm1646_vm3, %v1806_v0  ;;  %v3082_v0 = vld [vmem:[#allocation10] sm:$0xff] }
 0x39b   :  { %v3627_v56 = vpop.eup %3626  ;;  %3515 = vmatpush3.msra.mxu1 %v4171_v31  ;;  %3516 = vmatprep.mubr.msk.f32.mxu1 %vm3806_vm1, %v3805_v14 }
 0x39c   :  { %3524 = vmatprep.subr.mxu1 %v3805_v14  ;;  %v1810_v54 = vmul.f32 %v3627_v56, %v4167_v17 }
 0x39e   :  { %1832 = vst.msk [vmem:[#allocation12 + $0x48] sm:$0xff] %vm1646_vm3, %v1810_v54  ;;  %3517 = vmatmul.mubr.msk.f32.vlgmr.msra.gmra.mxu1 %vm1646_vm3, %v1810_v54 }
 0x39f   :  { %3525 = vmatpush3.msra.mxu1 %v418_v33  ;;  %3526 = vmatprep.mubr.msk.f32.mxu1 %vm3806_vm1, %v3805_v14 }
 0x3a0   :  { %3534 = vmatprep.subr.mxu1 %v3805_v14 }
 0x3ab   :  { %v1757_v26 = vpop.xlane.xlu1 %1756 }
 0x3ac   :  { %3628 = vrcp.f32 %v1757_v26 }
 0x3af   :  { %v1751_v10 = vpop.xlane.xlu1 %1750 }
 0x3b0   :  { %3630 = vrcp.f32 %v1751_v10 }
 0x3b3   :  { %v1763_v31 = vpop.xlane.xlu1 %1762 }
 0x3b4   :  { %3632 = vrcp.f32 %v1763_v31 }
 0x3b7   :  { %v1769_v40 = vpop.xlane.xlu1 %1768 }
 0x3b8   :  { %3634 = vrcp.f32 %v1769_v40 }
 0x3b9   :  { %v3629_v57 = vpop.eup %3628 }
 0x3ba   :  { %v1800_v17 = vmul.f32 %v3629_v57, %v4179_v58 }
 0x3bb   :  { %v1775_v1 = vpop.xlane.xlu1 %1774 }
 0x3bc   :  { %3636 = vrcp.f32 %v1775_v1  ;;  %1827 = vst.msk [vmem:[#allocation12 + $0x20] sm:$0xff] %vm1646_vm3, %v1800_v17 }
 0x3bd   :  { %v3631_v5 = vpop.eup %3630 }
 0x3be   :  { %v1796_v43 = vmul.f32 %v3631_v5, %v4181_v41 }
 0x3bf   :  { %v1787_v50 = vpop.xlane.xlu0 %1786  ;;  %v1781_v6 = vpop.xlane.xlu1 %1780 }
 0x3c0   :  { %3638 = vrcp.f32 %v1787_v50  ;;  %1825 = vst.msk [vmem:[#allocation12 + $0x10] sm:$0xff] %vm1646_vm3, %v1796_v43  ;;  %3482 = vmatmul.mubr.msk.f32.vlgmr.msra.gmra.mxu0 %vm1646_vm3, %v1796_v43 }
 0x3c1   :  { %v3633_v45 = vpop.eup %3632  ;;  %3640 = vrcp.f32 %v1781_v6  ;;  %3490 = vmatpush3.msra.mxu0 %v4134_v61  ;;  %3491 = vmatprep.mubr.msk.f32.mxu0 %vm3806_vm1, %v3805_v14 }
 0x3c2   :  { %3499 = vmatprep.subr.mxu0 %v3805_v14  ;;  %v1804_v58 = vmul.f32 %v3633_v45, %v4190_v11 }
 0x3c3   :  { %v1778_v7 = vpop.xlane.xlu0 %1777  ;;  %v442_v30 = vpop.permute.xlu1 %441 }
 0x3c4   :  { %3642 = vrcp.f32 %v1778_v7  ;;  %3492 = vmatmul.mubr.msk.f32.vlgmr.msra.gmra.mxu0 %vm1646_vm3, %v1800_v17  ;;  %1829 = vst.msk [vmem:[#allocation12 + $0x30] sm:$0xff] %vm1646_vm3, %v1804_v58 }
 0x3c5   :  { %v3635_v41 = vpop.eup %3634  ;;  %3500 = vmatpush3.msra.mxu0 %v4142_v2  ;;  %3501 = vmatprep.mubr.msk.f32.mxu0 %vm3806_vm1, %v3805_v14 }
 0x3c6   :  { %3509 = vmatprep.subr.mxu0 %v3805_v14  ;;  %v1808_v61 = vmul.f32 %v3635_v41, %v4195_v15 }
 0x3c7   :  { %v1784_v47 = vpop.xlane.xlu0 %1783 }
 0x3c8   :  { %3644 = vrcp.f32 %v1784_v47  ;;  %3502 = vmatmul.mubr.msk.f32.vlgmr.msra.gmra.mxu0 %vm1646_vm3, %v1804_v58  ;;  %1831 = vst.msk [vmem:[#allocation12 + $0x40] sm:$0xff] %vm1646_vm3, %v1808_v61 }
 0x3c9   :  { %v3637_v8 = vpop.eup %3636  ;;  %3510 = vmatpush3.msra.mxu0 %v3951_v19  ;;  %3511 = vmatprep.mubr.msk.f32.mxu0 %vm3806_vm1, %v3805_v14 }
 0x3ca   :  { %3519 = vmatprep.subr.mxu0 %v3805_v14  ;;  %v1812_v2 = vmul.f32 %v3637_v8, %v4199_v20 }
 0x3cb   :  { %v1790_v9 = vpop.xlane.xlu0 %1789 }
 0x3cc   :  { %3646 = vrcp.f32 %v1790_v9  ;;  %3512 = vmatmul.mubr.msk.f32.vlgmr.msra.gmra.mxu0 %vm1646_vm3, %v1808_v61  ;;  %1833 = vst.msk [vmem:[#allocation12 + $0x50] sm:$0xff] %vm1646_vm3, %v1812_v2 }
 0x3cd   :  { %v3639_v11 = vpop.eup %3638  ;;  %3520 = vmatpush3.msra.mxu0 %v4144_v3  ;;  %3521 = vmatprep.mubr.msk.f32.mxu0 %vm3806_vm1, %v3805_v14 }
 0x3ce   :  { %v3641_v19 = vpop.eup %3640  ;;  %3529 = vmatprep.subr.mxu0 %v3805_v14  ;;  %v1820_v24 = vmul.f32 %v3639_v11, %v4205_v36 }
 0x3cf   :  { %v1816_v12 = vmul.f32 %v3641_v19, %v4203_v21  ;;  %v436_v49 = vpop.permute.xlu0 %435 }
 0x3d0   :  { %3522 = vmatmul.mubr.msk.f32.vlgmr.msra.gmra.mxu0 %vm1646_vm3, %v1812_v2  ;;  %1837 = vst.msk [vmem:[#allocation12 + $0x70] sm:$0xff] %vm1646_vm3, %v1820_v24 }
 0x3d1   :  { %v3643_v13 = vpop.eup %3642  ;;  %3530 = vmatpush3.msra.mxu0 %v4236_v39  ;;  %3531 = vmatprep.mubr.msk.f32.mxu0 %vm3806_vm1, %v3805_v14  ;;  %1835 = vst.msk [vmem:[#allocation12 + $0x60] sm:$0xff] %vm1646_vm3, %v1816_v12 }
 0x3d2   :  { %3539 = vmatprep.subr.mxu0 %v3805_v14  ;;  %v1814_v3 = vmul.f32 %v3643_v13, %v4211_v25 }
 0x3d4   :  { %1834 = vst.msk [vmem:[#allocation12 + $0x58] sm:$0xff] %vm1646_vm3, %v1814_v3  ;;  %3527 = vmatmul.mubr.msk.f32.vlgmr.msra.gmra.mxu1 %vm1646_vm3, %v1814_v3  ;;  %3532 = vmatmul.mubr.msk.f32.vlgmr.msra.gmra.mxu0 %vm1646_vm3, %v1816_v12 }
 0x3d5   :  { %v3645_v15 = vpop.eup %3644  ;;  %3535 = vmatpush3.msra.mxu1 %v4225_v34  ;;  %3540 = vmatpush3.msra.mxu0 %v436_v49 }
 0x3d6   :  { %3536 = vmatprep.mubr.msk.f32.mxu1 %vm3806_vm1, %v3805_v14  ;;  %3541 = vmatprep.mubr.msk.f32.mxu0 %vm3806_vm1, %v3805_v14  ;;  %v1818_v18 = vmul.f32 %v3645_v15, %v4215_v27 }
 0x3d7   :  { %3544 = vmatprep.subr.mxu1 %v3805_v14  ;;  %3549 = vmatprep.subr.mxu0 %v3085_v48 }
 0x3d8   :  { %1836 = vst.msk [vmem:[#allocation12 + $0x68] sm:$0xff] %vm1646_vm3, %v1818_v18  ;;  %3537 = vmatmul.mubr.msk.f32.vlgmr.msra.gmra.mxu1 %vm1646_vm3, %v1818_v18  ;;  %3542 = vmatmul.mubr.msk.f32.vlgmr.msra.gmra.mxu0 %vm1646_vm3, %v1820_v24 }
 0x3d9   :  { %v3647_v20 = vpop.eup %3646  ;;  %3545 = vmatpush3.msra.mxu1 %v442_v30  ;;  %3546 = vmatprep.mubr.msk.f32.mxu1 %vm3806_vm1, %v3805_v14 }
 0x3da   :  { %v1822_v55 = vmul.f32 %v3647_v20, %v4219_v29  ;;  %3550 = vmatpush3.msra.mxu0 %v3085_v48 }
 0x3db   :  { %3551 = vmatprep.subr.mxu0 %v3084_v53 }
 0x3dc   :  { %1838 = vst.msk [vmem:[#allocation12 + $0x78] sm:$0xff] %vm1646_vm3, %v1822_v55  ;;  %3547 = vmatmul.mubr.msk.f32.vlgmr.msra.gmra.mxu1 %vm1646_vm3, %v1822_v55  ;;  %3552 = vmatpush3.msra.mxu0 %v3084_v53 }
 0x3dd   :  { %3553 = vmatprep.subr.mxu0 %v3083_v16 }
 0x3de   :  { %3554 = vmatpush3.msra.mxu0 %v3083_v16 }
 0x3df   :  { %3555 = vmatprep.subr.mxu0 %v3082_v0 }
 0x3e0   :  { %3556 = vmatpush3.msra.mxu0 %v3082_v0 }
 0x42c   :  { %v4330_v21 = vpop.f32.mrf.mxu0 }
 0x42e   :  { %v3473_v36 = vpop.f32.mrf.mxu0 }
 0x447   :  { %v1981_v22 = vpop.f32.mrf.mxu1 }
 0x448   :  { %3009 = vrot.lane.b32.xlu0 %v1981_v22, %s3814_s9 }
 0x449   :  { %v3478_v63 = vpop.f32.mrf.mxu1 }
 0x44f   :  { %v2127_v25 = vpop.f32.mrf.mxu1 }
 0x451   :  { %v3488_v4 = vpop.f32.mrf.mxu1 }
 0x453   :  { %v2273_v27 = vpop.f32.mrf.mxu1 }
 0x455   :  { %v3498_v28 = vpop.f32.mrf.mxu1 }
 0x45a   :  { %v2419_v32 = vpop.f32.mrf.mxu1 }
 0x45c   :  { %v3508_v33 = vpop.f32.mrf.mxu1 }
 0x45e   :  { %v2565_v14 = vpop.f32.mrf.mxu1 }
 0x45f   :  { %3011 = vrot.lane.b32.xlu1 %v2565_v14, %s3814_s9 }
 0x460   :  { %v3518_v29 = vpop.f32.mrf.mxu1 }
 0x480   :  { %v2054_v34 = vpop.f32.mrf.mxu0 }
 0x481   :  { %3017 = vrot.lane.b32.xlu0 %v2054_v34, %s3801_s30 }
 0x482   :  { %v3483_v35 = vpop.f32.mrf.mxu0 }
 0x484   :  { %v2200_v37 = vpop.f32.mrf.mxu0 }
 0x485   :  { %3025 = vrot.lane.b32.xlu0 %v2127_v25, %s3815_s10 }
 0x486   :  { %v3493_v38 = vpop.f32.mrf.mxu0 }
 0x488   :  { %v2346_v39 = vpop.f32.mrf.mxu0 }
 0x489   :  { %3033 = vrot.lane.b32.xlu0 %v2200_v37, %s3816_s11 }
 0x48a   :  { %v3503_v42 = vpop.f32.mrf.mxu0 }
 0x48c   :  { %v4334_v44 = vpop.f32.mrf.mxu0 }
 0x48d   :  { %3041 = vrot.lane.b32.xlu0 %v2273_v27, %s3817_s12 }
 0x48e   :  { %v3513_v46 = vpop.f32.mrf.mxu0 }
 0x490   :  { %v2638_v62 = vpop.f32.mrf.mxu0 }
 0x491   :  { %3049 = vrot.lane.b32.xlu0 %v2346_v39, %s3818_s13  ;;  %3019 = vrot.lane.b32.xlu1 %v2638_v62, %s3801_s30 }
 0x492   :  { %v3523_v51 = vpop.f32.mrf.mxu0 }
 0x494   :  { %v2711_v52 = vpop.f32.mrf.mxu1  ;;  %v2784_v59 = vpop.f32.mrf.mxu0 }
 0x495   :  { %3057 = vrot.lane.b32.xlu0 %v2419_v32, %s3819_s14  ;;  %3027 = vrot.lane.b32.xlu1 %v2711_v52, %s3815_s10 }
 0x496   :  { %v3528_v60 = vpop.f32.mrf.mxu1  ;;  %v3533_v23 = vpop.f32.mrf.mxu0 }
 0x498   :  { %v2857_v56 = vpop.f32.mrf.mxu1  ;;  %v2930_v54 = vpop.f32.mrf.mxu0 }
 0x499   :  { %3035 = vrot.lane.b32.xlu1 %v2784_v59, %s3816_s11 }
 0x49a   :  { %v3538_v26 = vpop.f32.mrf.mxu1  ;;  %v3543_v10 = vpop.f32.mrf.mxu0 }
 0x49c   :  { %v3003_v31 = vpop.f32.mrf.mxu1 }
 0x49d   :  { %3043 = vrot.lane.b32.xlu1 %v2857_v56, %s3817_s12 }
 0x49e   :  { %v3548_v40 = vpop.f32.mrf.mxu1 }
 0x4a1   :  { %3051 = vrot.lane.b32.xlu1 %v2930_v54, %s3818_s13 }
 0x4a5   :  { %3059 = vrot.lane.b32.xlu1 %v3003_v31, %s3819_s14 }
 0x4ba   :  { %v3010_v57 = vpop.permute.xlu0 %3009 }
 0x4bb   :  { %v3063_v6 = vsel %vm445_vm2, %v4330_v21, %v3010_v57 }
 0x4d1   :  { %v3012_v43 = vpop.permute.xlu1 %3011 }
 0x4d2   :  { %v3064_v12 = vsel %vm445_vm2, %v4334_v44, %v3012_v43 }
 0x4f3   :  { %v3018_v17 = vpop.permute.xlu0 %3017 }
 0x4f4   :  { %v3065_v45 = vsel %vm1646_vm3, %v3063_v6, %v3018_v17 }
 0x4f7   :  { %v3026_v1 = vpop.permute.xlu0 %3025 }
 0x4f8   :  { %v3068_v41 = vsel %vm3067_vm4, %v3065_v45, %v3026_v1 }
 0x4fb   :  { %v3034_v5 = vpop.permute.xlu0 %3033 }
 0x4fc   :  { %v3071_v61 = vsel %vm3070_vm5, %v3068_v41, %v3034_v5 }
 0x4ff   :  { %v3042_v50 = vpop.permute.xlu0 %3041 }
 0x500   :  { %v3074_v47 = vsel %vm3073_vm6, %v3071_v61, %v3042_v50 }
 0x503   :  { %v3050_v58 = vpop.permute.xlu0 %3049  ;;  %v3020_v7 = vpop.permute.xlu1 %3019 }
 0x504   :  { %v3077_v8 = vsel %vm3076_vm7, %v3074_v47, %v3050_v58  ;;  %v3066_v13 = vsel %vm1646_vm3, %v3064_v12, %v3020_v7 }
 0x507   :  { %v3058_v2 = vpop.permute.xlu0 %3057  ;;  %v3028_v9 = vpop.permute.xlu1 %3027 }
 0x508   :  { %v3080_v11 = vsel %vm3079_vm8, %v3077_v8, %v3058_v2  ;;  %v3069_v49 = vsel %vm3067_vm4, %v3066_v13, %v3028_v9 }
 0x509   :  { %3557 = vmatprep.mubr.msk.f32.mxu0 %vm101_vm0, %v3080_v11 }
 0x50b   :  { %v3036_v19 = vpop.permute.xlu1 %3035 }
 0x50c   :  { %v3072_v15 = vsel %vm3070_vm5, %v3069_v49, %v3036_v19 }
 0x50f   :  { %v3044_v24 = vpop.permute.xlu1 %3043 }
 0x510   :  { %v3075_v18 = vsel %vm3073_vm6, %v3072_v15, %v3044_v24 }
 0x513   :  { %v3052_v3 = vpop.permute.xlu1 %3051 }
 0x514   :  { %v3078_v30 = vsel %vm3076_vm7, %v3075_v18, %v3052_v3 }
 0x517   :  { %v3060_v20 = vpop.permute.xlu1 %3059 }
 0x518   :  { %v3081_v55 = vsel %vm3079_vm8, %v3078_v30, %v3060_v20 }
 0x519   :  { %3558 = vmatmul.mubr.msk.f32.vlgmr.msra.gmra.mxu0 %vm101_vm0, %v3081_v55 }
 0x51a   :  { %3759 = shalt.err (!%p3756_p1)
}
 0x51b   :  { %3199 = dma.vmem_to_hbm [thread:$0]  %s3194_s16, 2048, %s4382_s7, [#allocation13], %s3800_s29, %s3800_s29, %s3801_s30  }
 0x51c   :  { %v3265_v21 = vld [vmem:[%s4380_s5] ss:$0 sm:$0xff]  ;;  %s3821_s20 = smov [#allocation11]  }
 0x51d   :  { %s3181_s21 = sshll.u32 %s3821_s20, 4  ;;  %s3182_s21 = int_to_ptr.vmem [resolvable:$true] %s3181_s21 }
 0x51e   :  { %s3768_s22 = scalar_lea.vmem %s3182_s21, 256  ;;  %p3773_p3 = scmp.lt.s32.totalorder %s3182_s21, %s3182_s21 }
 0x51f   :  { %p3769_p2 = scmp.ne.s32.totalorder %s3182_s21, %s3768_s22  ;;  %p3774_p4 = scmp.lt.s32.totalorder %s3768_s22, %s3768_s22 }
 0x521   :  { %p3775_p5 = por %p3774_p4, %p3773_p3 }
 0x523   :  { %p3776_p6 = pnand %p3775_p5, %p3769_p2 }
 0x5d9   :  { %v3559_v36 = vpop.f32.mrf.mxu0 }
 0x5da   :  { %v3171_v22 = vadd.f32 %v3559_v36, %v3265_v21 }
 0x5db   :  { %v3165_v63 = vpop.f32.mrf.mxu0 }
 0x5dc   :  { %3175 = vst.msk [vmem:[#allocation11 + $0x8] sm:$0xff] %vm101_vm0, %v3171_v22  ;;  %v3166_v25 = vadd.f32 %v3265_v21, %v3165_v63 }
 0x5de   :  { %3174 = vst.msk [vmem:[#allocation11] sm:$0xff] %vm101_vm0, %v3166_v25 }
 0x5df   :  { %3779 = shalt.err (!%p3776_p6)
}
 0x5e0   :  { %3187 = dma.vmem_to_hbm [thread:$0]  %s3182_s21, 256, %s4381_s6, [#allocation4], %s3800_s29, %s3800_s29, %s3801_s30  }
 0x5e1   :  { %3794 = dma.done.wait [#allocation4], 256  }
 0x5e2   :  { %3795 = vsyncadd [#allocation4], 4294967040 }
 0x5e3   :  { %3796 = dma.done.wait [#allocation13], 2048  }
 0x5e4   :  { %3797 = vsyncadd [#allocation13], 4294965248 }
 0x5e5   :  { %3206 = vsyncpa [#allocation3], 1 }
 0x5e6   :  { %3207 = vsyncpa [#allocation6], 1 }
 0x5e7   :  { %3208 = vsyncpa [#allocation9], 1 }
 0x5e8   :  { %3209 = vsyncpa [#allocation4], 1 }
 0x5e9   :  { %3210 = vsyncpa [#allocation13], 1 }

</bundles_post_ra>
